<compile_context>
chip_gen: v7x
topology: tpu7x:2x2x1
jax: 0.10.0
libtpu: 0.0.40
codegen_flags: <defaults>
</compile_context>

<pallas_src>
import functools
import math

import jax
import jax.numpy as jnp
from jax.experimental import pallas as pl
from jax.experimental.pallas import tpu as pltpu

# --- module hyper-parameters (from the PyTorch script) -----------------------
BLOCK_SIZE = 32          # block_size (max sequence length, also T here)
N_EMBED = 64             # n_embed
N_LAYER = 4              # n_layer
HEAD_SIZE = 16           # head_size
KERNEL_SIZE = 3          # DepthwiseConvolution kernel size
DROPOUT_RATE = 0.0       # dropout_rate == 0.0 -> identity (no-op)


# --- Pallas kernel ------------------------------------------------------------
def head_kernel(x_ref, w_ref, b_ref, o_ref, *, seq_len, head_size):
    """One tile of Bb batch elements per grid step.

    x_ref : (Bb*T, 3C)  bf16 shifted/concatenated input  [x[t-2] | x[t-1] | x[t]]
    w_ref : (3C, 3H)    bf16 conv-folded, scale-folded QKV weight, cols [k|q|v]
    b_ref : (1, 3H)     f32 conv bias (Q columns pre-scaled), cols [k|q|v]
    o_ref : (Bb, T*H)   f32 lane-dense output slab
    """
    T = seq_len
    H = head_size
    BT = x_ref.shape[0]            # Bb * T
    Bb = BT // T

    # --- fused QKV projection + causal depthwise conv: ONE MXU matmul --------
    # bf16 in / f32 accumulate; the conv taps and the attention scale are
    # already folded into w_ref / b_ref by the wrapper.
    qkv = jnp.dot(x_ref[...], w_ref[...],
                  preferred_element_type=jnp.float32) + b_ref[...]    # (BT, 3H)

    # --- split fused projection, restore the batch axis (one cast, then slice)
    qkv16 = qkv.astype(jnp.bfloat16)
    k = qkv16[:, 0:H].reshape(Bb, T, H)
    q = qkv16[:, H:2 * H].reshape(Bb, T, H)          # already scaled by C**-0.5
    v = qkv16[:, 2 * H:3 * H].reshape(Bb, T, H)

    # --- scaled causal attention (batched MXU matmuls, bf16 in / f32 acc) -----
    scores = jnp.einsum("bqd,bkd->bqk", q, k,
                        preferred_element_type=jnp.float32)           # (Bb, T, T)

    row = jax.lax.broadcasted_iota(jnp.int32, (T, T), 0)
    col = jax.lax.broadcasted_iota(jnp.int32, (T, T), 1)
    # -inf is safe: the causal diagonal is never masked, so no all-masked row.
    scores = jnp.where((col <= row)[None, :, :], scores, -jnp.inf)

    m = jnp.max(scores, axis=-1, keepdims=True)
    p = jnp.exp(scores - m)
    denom = jnp.sum(p, axis=-1, keepdims=True)
    wei = p * pl.reciprocal(denom, approx=True)       # EUP approx reciprocal

    # dropout with p = 0.0 is the identity (skipped)

    out = jnp.einsum("bts,bsh->bth", wei.astype(jnp.bfloat16), v,
                     preferred_element_type=jnp.float32)              # (Bb, T, H)

    # Lane-dense store: one relayout to a 512-lane slab, then unmasked vst.
    o_ref[...] = out.reshape(Bb, T * H)


# --- wrapper ------------------------------------------------------------------
def _pick_block_b(B, cap=64):
    """Pick the batch tile.  cap=64 keeps the per-tile VMEM footprint (bf16
    x_cat block double-buffered + lane-padded f32 intermediates) comfortably
    under the 16 MiB v5e scoped default and far under v7x's 64 MiB physical
    VMEM.  The output block shape is (block_b, T*H), so block_b must be a
    multiple of 8 or equal to B (the (8,128) rule)."""
    if B <= cap:
        return B                      # single tile covers B (full-dim block)
    for bb in range(cap, 0, -1):
        if B % bb == 0 and bb % 8 == 0:
            return bb
    return B                          # fallback: full-dim block


def head_forward(x, params, block_b=None):
    """x: (B, T, C) float32 -> (B, T, H) float32."""
    B, T, C = x.shape
    H = params["wk"].shape[0]
    if block_b is None:
        block_b = _pick_block_b(B)
    assert B % block_b == 0
    scale = C ** (-0.5)               # PyTorch code scales by n_embed**-0.5

    # --- fold the 3-tap causal conv (and the attention scale, for Q) into the
    #     QKV weight:  tap_s * (x[t-s] @ W^T)  ==  x[t-s] @ (W^T * tap_s)  -----
    def aug(w, cw):                   # w: (H, C), cw: (3, H) -> (3C, H)
        wt = w.T                      # (C, H)
        return jnp.concatenate([wt * cw[0][None, :],
                                wt * cw[1][None, :],
                                wt * cw[2][None, :]], axis=0)

    wk_aug = aug(params["wk"], params["ckw"])
    wq_aug = aug(params["wq"], params["cqw"]) * scale
    wv_aug = aug(params["wv"], params["cvw"])
    w_aug = jnp.concatenate([wk_aug, wq_aug, wv_aug],
                            axis=1).astype(jnp.bfloat16)              # (3C, 3H)
    bias = jnp.concatenate([params["ckb"], params["cqb"] * scale, params["cvb"]],
                           axis=1).astype(jnp.float32)                # (1, 3H)

    # --- shifted input slab: x_cat[t] = [x[t-2] | x[t-1] | x[t]], zero-padded
    #     per sequence (matches the causal left-pad of the depthwise conv) ----
    x_m1 = jnp.pad(x, ((0, 0), (1, 0), (0, 0)))[:, :T, :]
    x_m2 = jnp.pad(x, ((0, 0), (2, 0), (0, 0)))[:, :T, :]
    x_cat = jnp.concatenate([x_m2, x_m1, x], axis=-1)                 # (B, T, 3C)
    x_cat = x_cat.reshape(B * T, 3 * C).astype(jnp.bfloat16)

    kern = functools.partial(head_kernel, seq_len=T, head_size=H)
    grid = (B // block_b,)

    out = pl.pallas_call(
        kern,
        out_shape=jax.ShapeDtypeStruct((B, T * H), jnp.float32),
        grid_spec=pltpu.PrefetchScalarGridSpec(
            num_scalar_prefetch=0,
            grid=grid,
            in_specs=[
                pl.BlockSpec((block_b * T, 3 * C), lambda b: (b, 0)),  # x_cat tile
                pl.BlockSpec(w_aug.shape, lambda b: (0, 0)),           # folded W
                pl.BlockSpec(bias.shape, lambda b: (0, 0)),            # folded bias
            ],
            out_specs=pl.BlockSpec((block_b, T * H), lambda b: (b, 0)),
        ),
        compiler_params=pltpu.CompilerParams(
            dimension_semantics=("parallel",)),
    )(x_cat, w_aug, bias)
    return out.reshape(B, T, H)


# --- deterministic parameter init (mirrors the PyTorch __init__ distributions) -
def init_params(key, head_size=HEAD_SIZE, n_embed=N_EMBED, n_layer=N_LAYER,
                kernel_size=KERNEL_SIZE):
    ks = jax.random.split(key, 9)
    # xavier_uniform with gain 1/sqrt(2) for the Linear weights (H, C)
    xav = (1.0 / math.sqrt(2.0)) * math.sqrt(6.0 / (n_embed + head_size))
    wk = jax.random.uniform(ks[0], (head_size, n_embed), jnp.float32, -xav, xav)
    wq = jax.random.uniform(ks[1], (head_size, n_embed), jnp.float32, -xav, xav)
    wv = jax.random.uniform(ks[2], (head_size, n_embed), jnp.float32, -xav, xav)
    wv = ((9 * n_layer) ** (-0.25)) * wv
    # depthwise Conv1d default init: uniform(-1/sqrt(fan_in), ...), fan_in = K
    cb = 1.0 / math.sqrt(kernel_size)
    ckw = jax.random.uniform(ks[3], (kernel_size, head_size), jnp.float32, -cb, cb)
    ckb = jax.random.uniform(ks[4], (1, head_size), jnp.float32, -cb, cb)
    cqw = jax.random.uniform(ks[5], (kernel_size, head_size), jnp.float32, -cb, cb)
    cqb = jax.random.uniform(ks[6], (1, head_size), jnp.float32, -cb, cb)
    cvw = jax.random.uniform(ks[7], (kernel_size, head_size), jnp.float32, -cb, cb)
    cvb = jax.random.uniform(ks[8], (1, head_size), jnp.float32, -cb, cb)
    return dict(wk=wk, wq=wq, wv=wv,
                ckw=ckw, ckb=ckb, cqw=cqw, cqb=cqb, cvw=cvw, cvb=cvb)


# --- pure-JAX f32 reference (correctness oracle) --------------------------------
def head_reference(x, params):
    B, T, C = x.shape

    def proj(w, cw, cb):
        lin = jnp.einsum("btc,hc->bth", x, w)                       # (B, T, H)
        padded = jnp.pad(lin, ((0, 0), (KERNEL_SIZE - 1, 0), (0, 0)))
        return (padded[:, 0:T, :] * cw[0][None, None, :]
                + padded[:, 1:T + 1, :] * cw[1][None, None, :]
                + padded[:, 2:T + 2, :] * cw[2][None, None, :]
                + cb[None, :, :])

    k = proj(params["wk"], params["ckw"], params["ckb"])
    q = proj(params["wq"], params["cqw"], params["cqb"])
    v = proj(params["wv"], params["cvw"], params["cvb"])
    wei = jnp.einsum("bth,bsh->bts", q, k) * (C ** -0.5)
    mask = jnp.tril(jnp.ones((T, T), bool))
    wei = jnp.where(mask[None], wei, -jnp.inf)
    wei = jax.nn.softmax(wei, axis=-1)
    return jnp.einsum("bts,bsh->bth", wei, v)


if __name__ == "__main__":
    key = jax.random.PRNGKey(0)
    pkey, xkey = jax.random.split(key)

    B, T, C = 8, BLOCK_SIZE, N_EMBED            # x: (8, 32, 64)
    x = jax.random.normal(xkey, (B, T, C), dtype=jnp.float32)
    params = init_params(pkey)

    out = jax.block_until_ready(head_forward(x, params))
    ref = head_reference(x, params)

    assert out.shape == (B, T, HEAD_SIZE)
    # MXU inputs are bf16 (f32 accumulation), the conv/scale are folded into a
    # bf16 weight, and the softmax reciprocal is the approximate EUP one, so
    # compare against the f32 oracle with a relaxed tolerance (real bugs show
    # errors >> 2e-2).
    assert jnp.allclose(out, ref, atol=2e-2, rtol=2e-2), "mismatch vs JAX reference"

    print("KERNEL_OK")
</pallas_src>

<mosaic_0001>
module attributes {stable_mosaic.version = 11 : i64} {
  func.func @head_kernel(%arg0: i32, %arg1: memref<256x192xbf16, #tpu.memory_space<vmem>>, %arg2: memref<192x48xbf16, #tpu.memory_space<vmem>>, %arg3: memref<1x48xf32, #tpu.memory_space<vmem>>, %arg4: memref<8x512xf32, #tpu.memory_space<vmem>>) attributes {dimension_semantics = [#tpu.dimension_semantics<parallel>], iteration_bounds = array<i64: 1>, scalar_prefetch = 0 : i64, scratch_operands = 0 : i64, tpu.core_type = #tpu.core_type<tc>, window_params = [{transform_indices = @transform_0, window_bounds = array<i64: 256, 192>}, {pipeline_mode = #tpu.pipeline_mode<synchronous>, transform_indices = @transform_1, window_bounds = array<i64: 192, 48>}, {pipeline_mode = #tpu.pipeline_mode<synchronous>, transform_indices = @transform_2, window_bounds = array<i64: 1, 48>}, {transform_indices = @transform_3, window_bounds = array<i64: 8, 512>}]} {
    %c0 = arith.constant 0 : index
    %c0_0 = arith.constant 0 : index
    %0 = vector.load %arg1[%c0, %c0_0] : memref<256x192xbf16, #tpu.memory_space<vmem>>, vector<256x192xbf16>
    %c0_1 = arith.constant 0 : index
    %c0_2 = arith.constant 0 : index
    %1 = vector.load %arg2[%c0_1, %c0_2] : memref<192x48xbf16, #tpu.memory_space<vmem>>, vector<192x48xbf16>
    %cst = arith.constant dense<0.000000e+00> : vector<256x48xf32>
    %2 = tpu.matmul %0, %1, %cst {dimension_numbers = #tpu.dot_dimension_numbers<[1], [0], [0], [1], [0, 0, 1, 1], [], []>} : vector<256x192xbf16>, vector<192x48xbf16>, vector<256x48xf32> -> vector<256x48xf32>
    %c0_3 = arith.constant 0 : index
    %c0_4 = arith.constant 0 : index
    %3 = vector.load %arg3[%c0_3, %c0_4] : memref<1x48xf32, #tpu.memory_space<vmem>>, vector<1x48xf32>
    %4 = vector.broadcast %3 : vector<1x48xf32> to vector<256x48xf32>
    %5 = arith.addf %2, %4 : vector<256x48xf32>
    %6 = arith.truncf %5 : vector<256x48xf32> to vector<256x48xbf16>
    %7 = vector.extract_strided_slice %6 {offsets = [0, 0], sizes = [256, 16], strides = [1, 1]} : vector<256x48xbf16> to vector<256x16xbf16>
    %8 = vector.shape_cast %7 : vector<256x16xbf16> to vector<8x32x16xbf16>
    %9 = vector.extract_strided_slice %6 {offsets = [0, 16], sizes = [256, 16], strides = [1, 1]} : vector<256x48xbf16> to vector<256x16xbf16>
    %10 = vector.shape_cast %9 : vector<256x16xbf16> to vector<8x32x16xbf16>
    %11 = vector.extract_strided_slice %6 {offsets = [0, 32], sizes = [256, 16], strides = [1, 1]} : vector<256x48xbf16> to vector<256x16xbf16>
    %12 = vector.shape_cast %11 : vector<256x16xbf16> to vector<8x32x16xbf16>
    "tpu.trace_start"() <{level = 10 : i32, message = "bqd,bkd->bqk"}> : () -> ()
    %cst_5 = arith.constant dense<0.000000e+00> : vector<8x32x32xf32>
    %13 = tpu.matmul %10, %8, %cst_5 {dimension_numbers = #tpu.dot_dimension_numbers<[2], [2], [1], [1], [0, 0, 0, 1, 1, 1], [0], [0]>} : vector<8x32x16xbf16>, vector<8x32x16xbf16>, vector<8x32x32xf32> -> vector<8x32x32xf32>
    "tpu.trace_stop"() : () -> ()
    %14 = tpu.iota {dimensions = array<i32: 0>} : vector<32x32xi32>
    %15 = tpu.iota {dimensions = array<i32: 1>} : vector<32x32xi32>
    %16 = arith.cmpi sle, %15, %14 : vector<32x32xi32>
    %17 = vector.shape_cast %16 : vector<32x32xi1> to vector<1x32x32xi1>
    %cst_6 = arith.constant 0xFF800000 : f32
    %18 = vector.shape_cast %17 : vector<1x32x32xi1> to vector<1x32x32xi1>
    %19 = vector.broadcast %18 : vector<1x32x32xi1> to vector<8x32x32xi1>
    %20 = vector.broadcast %cst_6 : f32 to vector<8x32x32xf32>
    %21 = arith.select %19, %13, %20 : vector<8x32x32xi1>, vector<8x32x32xf32>
    %cst_7 = arith.constant dense<0xFF800000> : vector<8x32xf32>
    %22 = vector.multi_reduction <maximumf>, %21, %cst_7 [2] : vector<8x32x32xf32> to vector<8x32xf32>
    %23 = vector.shape_cast %22 : vector<8x32xf32> to vector<8x32x1xf32>
    %24 = vector.broadcast %23 : vector<8x32x1xf32> to vector<8x32x32xf32>
    %25 = arith.subf %21, %24 : vector<8x32x32xf32>
    %26 = math.exp %25 : vector<8x32x32xf32>
    %cst_8 = arith.constant dense<0.000000e+00> : vector<8x32xf32>
    %27 = vector.multi_reduction <add>, %26, %cst_8 [2] : vector<8x32x32xf32> to vector<8x32xf32>
    %28 = vector.shape_cast %27 : vector<8x32xf32> to vector<8x32x1xf32>
    %29 = tpu.reciprocal %28 {approx = true} : vector<8x32x1xf32> -> vector<8x32x1xf32>
    %30 = vector.broadcast %29 : vector<8x32x1xf32> to vector<8x32x32xf32>
    %31 = arith.mulf %26, %30 : vector<8x32x32xf32>
    %32 = arith.truncf %31 : vector<8x32x32xf32> to vector<8x32x32xbf16>
    "tpu.trace_start"() <{level = 10 : i32, message = "bts,bsh->bth"}> : () -> ()
    %cst_9 = arith.constant dense<0.000000e+00> : vector<8x32x16xf32>
    %33 = tpu.matmul %32, %12, %cst_9 {dimension_numbers = #tpu.dot_dimension_numbers<[2], [1], [1], [2], [0, 0, 0, 1, 1, 2], [0], [0]>} : vector<8x32x32xbf16>, vector<8x32x16xbf16>, vector<8x32x16xf32> -> vector<8x32x16xf32>
    "tpu.trace_stop"() : () -> ()
    %34 = vector.shape_cast %33 : vector<8x32x16xf32> to vector<8x512xf32>
    %c0_10 = arith.constant 0 : index
    %c0_11 = arith.constant 0 : index
    %35 = vector.load %arg4[%c0_10, %c0_11] : memref<8x512xf32, #tpu.memory_space<vmem>>, vector<8x512xf32>
    tpu.vector_store %arg4[%c0_10, %c0_11], %34 {strides = array<i32>} : memref<8x512xf32, #tpu.memory_space<vmem>>, vector<8x512xf32>,
    return
  }
  func.func @transform_0(%arg0: i32) -> (i32, i32) {
    %c0_i32 = arith.constant 0 : i32
    %c0_i32_0 = arith.constant 0 : i32
    return %arg0, %c0_i32 : i32, i32
  }
  func.func @transform_1(%arg0: i32) -> (i32, i32) {
    %c0_i32 = arith.constant 0 : i32
    %c0_i32_0 = arith.constant 0 : i32
    %c0_i32_1 = arith.constant 0 : i32
    return %c0_i32, %c0_i32_0 : i32, i32
  }
  func.func @transform_2(%arg0: i32) -> (i32, i32) {
    %c0_i32 = arith.constant 0 : i32
    %c0_i32_0 = arith.constant 0 : i32
    %c0_i32_1 = arith.constant 0 : i32
    return %c0_i32, %c0_i32_0 : i32, i32
  }
  func.func @transform_3(%arg0: i32) -> (i32, i32) {
    %c0_i32 = arith.constant 0 : i32
    %c0_i32_0 = arith.constant 0 : i32
    return %arg0, %c0_i32 : i32, i32
  }
}

</mosaic_0001>

<bundles_post_ra>
// kernel: tpu_custom_call.1
= control target key start
LH: loop header
LB: loop body
LE: loop exit
PB: predicated region body
PF: predicated region fallthrough
CT: control target
= control target key end

     0   :  { %v3196_v1 = vmov 0   ;;  %vm295_vm0 = vcmask 523264   ;;  %s4298_s0 = inlined_call_operand.vmem [shape: bf16[256,192], index: 0, kind: input, shape index: {}]   ;;  %s4299_s1 = inlined_call_operand.vmem [shape: bf16[192,48], index: 1, kind: input, shape index: {}]   ;;  %s4300_s2 = inlined_call_operand.vmem [shape: f32[1,48], index: 2, kind: input, shape index: {}]   ;;  %s4301_s3 = inlined_call_operand.hbm [shape: f32[8,512], index: 3, kind: output, shape index: {}]  }
   0x1   :  { %v2984_v0 = vld [vmem:[%s4299_s1] sm:$0xff]   ;;  %344 = vmatprep.subr.bf16.mxu0 %v3196_v1  ;;  %v2985_v2 = vld [vmem:[%s4299_s1 + $0x8] sm:$0xff]   ;;  %v2986_v3 = vld [vmem:[%s4299_s1 + $0x10] sm:$0xff]  }
   0x2   :  { %345 = vmatpush1.bf16.msra.mxu0 %v2984_v0  ;;  %v2987_v4 = vld [vmem:[%s4299_s1 + $0x18] sm:$0xff]   ;;  %v2998_v5 = vld [vmem:[%s4298_s0 + $0x4] ss:$8 sps:$4 sm:$0xff]   ;;  %v2990_v8 = vld [vmem:[%s4299_s1 + $0x30] sm:$0xff]  }
   0x3   :  { %346 = vmatprep.subr.bf16.mxu0 %v3196_v1  ;;  %v2988_v6 = vld [vmem:[%s4299_s1 + $0x20] sm:$0xff]   ;;  %2717 = vmatprep.mubr.msk.bf16.mxu0 %vm295_vm0, %v2998_v5  ;;  %v2989_v7 = vld [vmem:[%s4299_s1 + $0x28] sm:$0xff]   ;;  %v2991_v9 = vld [vmem:[%s4299_s1 + $0x38] sm:$0xff]  }
   0x4   :  { %v2992_v10 = vld [vmem:[%s4299_s1 + $0x40] sm:$0xff]  }
   0x6   :  { %347 = vmatpush1.bf16.msra.mxu0 %v2985_v2 }
   0x7   :  { %348 = vmatprep.subr.bf16.mxu0 %v3196_v1 }
   0xa   :  { %349 = vmatpush1.bf16.msra.mxu0 %v2986_v3 }
   0xb   :  { %350 = vmatprep.subr.bf16.mxu0 %v3196_v1 }
   0xe   :  { %351 = vmatpush1.bf16.msra.mxu0 %v2987_v4 }
   0xf   :  { %352 = vmatprep.subr.bf16.mxu0 %v3196_v1 }
  0x12   :  { %353 = vmatpush1.bf16.msra.mxu0 %v2988_v6 }
  0x13   :  { %354 = vmatprep.subr.bf16.mxu0 %v3196_v1 }
  0x16   :  { %355 = vmatpush1.bf16.msra.mxu0 %v2989_v7 }
  0x17   :  { %356 = vmatprep.subr.bf16.mxu0 %v3196_v1 }
  0x1a   :  { %357 = vmatpush1.bf16.msra.mxu0 %v2990_v8 }
  0x1b   :  { %358 = vmatprep.subr.bf16.mxu0 %v3196_v1 }
  0x1e   :  { %359 = vmatpush1.bf16.msra.mxu0 %v2991_v9 }
  0x1f   :  { %360 = vmatprep.subr.bf16.mxu0 %v3196_v1 }
  0x20   :  { %8 = vsyncpa [#allocation3], 0  ;;  %v2993_v11 = vld [vmem:[%s4299_s1 + $0x48] sm:$0xff]   ;;  %v2994_v12 = vld [vmem:[%s4299_s1 + $0x50] sm:$0xff]   ;;  %vm527_vm1 = vcmask 130048   ;;  %vm1109_vm3 = vcmask 261120  }
  0x21   :  { %v2995_v13 = vld [vmem:[%s4299_s1 + $0x58] sm:$0xff]   ;;  %v2996_v14 = vld [vmem:[%s4298_s0] ss:$8 sps:$4 sm:$0xff]   ;;  %v3002_v17 = vld [vmem:[%s4298_s0 + $0x24] ss:$8 sps:$4 sm:$0xff]   ;;  %s3197_s1 = smov 112  }
  0x22   :  { %361 = vmatpush1.bf16.msra.mxu0 %v2992_v10  ;;  %v2999_v15 = vld [vmem:[%s4298_s0 + $0x14] ss:$8 sps:$4 sm:$0xff]   ;;  %v3001_v16 = vld [vmem:[%s4298_s0 + $0x10] ss:$8 sps:$4 sm:$0xff]   ;;  %v3004_v18 = vld [vmem:[%s4298_s0 + $0x20] ss:$8 sps:$4 sm:$0xff]  }
  0x23   :  { %362 = vmatprep.subr.bf16.mxu0 %v3196_v1  ;;  %v3005_v19 = vld [vmem:[%s4298_s0 + $0x34] ss:$8 sps:$4 sm:$0xff]   ;;  %v3007_v20 = vld [vmem:[%s4298_s0 + $0x30] ss:$8 sps:$4 sm:$0xff]   ;;  %v3008_v21 = vld [vmem:[%s4298_s0 + $0x44] ss:$8 sps:$4 sm:$0xff]  }
  0x24   :  { %v3010_v22 = vld [vmem:[%s4298_s0 + $0x40] ss:$8 sps:$4 sm:$0xff]   ;;  %v3011_v23 = vld [vmem:[%s4298_s0 + $0x54] ss:$8 sps:$4 sm:$0xff]   ;;  %v3013_v24 = vld [vmem:[%s4298_s0 + $0x50] ss:$8 sps:$4 sm:$0xff]  }
  0x25   :  { %v3014_v25 = vld [vmem:[%s4298_s0 + $0x64] ss:$8 sps:$4 sm:$0xff]   ;;  %v3016_v26 = vld [vmem:[%s4298_s0 + $0x60] ss:$8 sps:$4 sm:$0xff]   ;;  %v3017_v27 = vld [vmem:[%s4298_s0 + $0x74] ss:$8 sps:$4 sm:$0xff]  }
  0x26   :  { %363 = vmatpush1.bf16.msra.mxu0 %v2993_v11  ;;  %v3019_v28 = vld [vmem:[%s4298_s0 + $0x70] ss:$8 sps:$4 sm:$0xff]   ;;  %v3020_v29 = vld [vmem:[%s4298_s0 + $0x84] ss:$8 sps:$4 sm:$0xff]   ;;  %v3022_v30 = vld [vmem:[%s4298_s0 + $0x80] ss:$8 sps:$4 sm:$0xff]  }
  0x27   :  { %364 = vmatprep.subr.bf16.mxu0 %v3196_v1  ;;  %v3023_v31 = vld [vmem:[%s4298_s0 + $0x94] ss:$8 sps:$4 sm:$0xff]   ;;  %v3025_v32 = vld [vmem:[%s4298_s0 + $0x90] ss:$8 sps:$4 sm:$0xff]   ;;  %v3026_v33 = vld [vmem:[%s4298_s0 + $0xa4] ss:$8 sps:$4 sm:$0xff]  }
  0x28   :  { %v3028_v34 = vld [vmem:[%s4298_s0 + $0xa0] ss:$8 sps:$4 sm:$0xff]   ;;  %v3029_v35 = vld [vmem:[%s4298_s0 + $0xb4] ss:$8 sps:$4 sm:$0xff]   ;;  %v3031_v36 = vld [vmem:[%s4298_s0 + $0xb0] ss:$8 sps:$4 sm:$0xff]  }
  0x29   :  { %v3032_v37 = vld [vmem:[%s4298_s0 + $0xc4] ss:$8 sps:$4 sm:$0xff]   ;;  %v3034_v38 = vld [vmem:[%s4298_s0 + $0xc0] ss:$8 sps:$4 sm:$0xff]   ;;  %v3035_v39 = vld [vmem:[%s4298_s0 + $0xd4] ss:$8 sps:$4 sm:$0xff]  }
  0x2a   :  { %365 = vmatpush1.bf16.msra.mxu0 %v2994_v12  ;;  %v3037_v40 = vld [vmem:[%s4298_s0 + $0xd0] ss:$8 sps:$4 sm:$0xff]   ;;  %v3038_v41 = vld [vmem:[%s4298_s0 + $0xe4] ss:$8 sps:$4 sm:$0xff]   ;;  %v3040_v42 = vld [vmem:[%s4298_s0 + $0xe0] ss:$8 sps:$4 sm:$0xff]  }
  0x2b   :  { %366 = vmatprep.subr.bf16.mxu0 %v3196_v1  ;;  %v3041_v43 = vld [vmem:[%s4298_s0 + $0xf4] ss:$8 sps:$4 sm:$0xff]   ;;  %v3043_v44 = vld [vmem:[%s4298_s0 + $0xf0] ss:$8 sps:$4 sm:$0xff]   ;;  %v3378_v45 = vld [vmem:[%s4300_s2] ss:$0 sm:$0xff] }
  0x2c   :  { %s3198_s0 = smov 96   ;;  %s3201_s2 = smov 16   ;;  %vm2624_vm7 = vcmask 392192   ;;  %vm2627_vm8 = vcmask 654336   ;;  %vm2631_vm9 = vcmask 916480   ;;  %vm2629_vm10 = vcmask 785408  }
  0x2d   :  { %s3202_s19 = smov 32   ;;  %s3203_s20 = smov 48  }
  0x2e   :  { %367 = vmatpush1.bf16.msra.mxu0 %v2995_v13  ;;  %s3204_s21 = smov 64   ;;  %s3205_s22 = smov 80  }
  0x2f   :  { %s3206_s23 = smov [#allocation2]  }
  0x30   :  { %s2664_s24 = sshll.u32 %s3206_s23, 4  ;;  %s2665_s24 = int_to_ptr.vmem [resolvable:$true] %s2664_s24 }
  0x31   :  { %377 = vmatmul.mubr.bf16.vlgmr.msra.gmra.mrb[0].mxu0 %v2996_v14  ;;  %s3172_s25 = scalar_lea.vmem %s2665_s24, 512  ;;  %p3177_p1 = scmp.lt.s32.totalorder %s2665_s24, %s2665_s24 }
  0x32   :  { %2718 = vmatprep.mubr.msk.bf16.mxu0 %vm295_vm0, %v2999_v15  ;;  %p3173_p0 = scmp.ne.s32.totalorder %s2665_s24, %s3172_s25  ;;  %p3178_p2 = scmp.lt.s32.totalorder %s3172_s25, %s3172_s25 }
  0x34   :  { %p3179_p3 = por %p3178_p2, %p3177_p1 }
  0x36   :  { %p3180_p4 = pnand %p3179_p3, %p3173_p0 }
  0x39   :  { %385 = vmatmul.mubr.bf16.gmra.mrb[4].mxu0 %v3001_v16 }
  0x3a   :  { %2719 = vmatprep.mubr.msk.bf16.mxu0 %vm295_vm0, %v3002_v17 }
  0x41   :  { %393 = vmatmul.mubr.bf16.gmra.mrb[8].mxu0 %v3004_v18 }
  0x42   :  { %2720 = vmatprep.mubr.msk.bf16.mxu0 %vm295_vm0, %v3005_v19 }
  0x49   :  { %401 = vmatmul.mubr.bf16.gmra.mrb[12].mxu0 %v3007_v20 }
  0x4a   :  { %2721 = vmatprep.mubr.msk.bf16.mxu0 %vm295_vm0, %v3008_v21 }
  0x51   :  { %409 = vmatmul.mubr.bf16.gmra.mrb[16].mxu0 %v3010_v22 }
  0x52   :  { %2722 = vmatprep.mubr.msk.bf16.mxu0 %vm295_vm0, %v3011_v23 }
  0x59   :  { %417 = vmatmul.mubr.bf16.gmra.mrb[20].mxu0 %v3013_v24 }
  0x5a   :  { %2723 = vmatprep.mubr.msk.bf16.mxu0 %vm295_vm0, %v3014_v25 }
  0x61   :  { %425 = vmatmul.mubr.bf16.gmra.mrb[24].mxu0 %v3016_v26 }
  0x62   :  { %2724 = vmatprep.mubr.msk.bf16.mxu0 %vm295_vm0, %v3017_v27 }
  0x69   :  { %433 = vmatmul.mubr.bf16.gmra.mrb[28].mxu0 %v3019_v28 }
  0x6a   :  { %2725 = vmatprep.mubr.msk.bf16.mxu0 %vm295_vm0, %v3020_v29 }
  0x71   :  { %441 = vmatmul.mubr.bf16.gmra.mrb[32].mxu0 %v3022_v30 }
  0x72   :  { %2726 = vmatprep.mubr.msk.bf16.mxu0 %vm295_vm0, %v3023_v31 }
  0x79   :  { %449 = vmatmul.mubr.bf16.gmra.mrb[36].mxu0 %v3025_v32 }
  0x7a   :  { %2727 = vmatprep.mubr.msk.bf16.mxu0 %vm295_vm0, %v3026_v33 }
  0x81   :  { %457 = vmatmul.mubr.bf16.gmra.mrb[40].mxu0 %v3028_v34 }
  0x82   :  { %2728 = vmatprep.mubr.msk.bf16.mxu0 %vm295_vm0, %v3029_v35 }
  0x89   :  { %465 = vmatmul.mubr.bf16.gmra.mrb[44].mxu0 %v3031_v36 }
  0x8a   :  { %2729 = vmatprep.mubr.msk.bf16.mxu0 %vm295_vm0, %v3032_v37 }
  0x91   :  { %473 = vmatmul.mubr.bf16.gmra.mrb[48].mxu0 %v3034_v38 }
  0x92   :  { %2730 = vmatprep.mubr.msk.bf16.mxu0 %vm295_vm0, %v3035_v39 }
  0x99   :  { %481 = vmatmul.mubr.bf16.gmra.mrb[52].mxu0 %v3037_v40 }
  0x9a   :  { %2731 = vmatprep.mubr.msk.bf16.mxu0 %vm295_vm0, %v3038_v41 }
  0xa1   :  { %489 = vmatmul.mubr.bf16.gmra.mrb[56].mxu0 %v3040_v42 }
  0xa2   :  { %2732 = vmatprep.mubr.msk.bf16.mxu0 %vm295_vm0, %v3041_v43 }
  0xa9   :  { %497 = vmatmul.mubr.bf16.gmra.mrb[60].mxu0 %v3043_v44 }
 0x104   :  { %v378_v46 = vpop.f32.mrb[0].mxu0 }
 0x105   :  { %v380_v47 = vpop.f32.mrb[1].mxu0  ;;  %v379_v49 = vadd.f32 %v3378_v45, %v378_v46 }
 0x106   :  { %v381_v48 = vpop.f32.mrb[2].mxu0 }
 0x107   :  { %v382_v50 = vadd.f32 %v3378_v45, %v381_v48  ;;  %v383_v51 = vpop.f32.mrb[3].mxu0 }
 0x109   :  { %v3382_v52 = vpack.c.bf16 %v382_v50, %v379_v49 }
 0x10b   :  { %523 = vrot.lane.b32.xlu0 %v3382_v52, %s3197_s1  ;;  %2957 = vmatprep.subr.msk.bf16.mxu1 %vm527_vm1, %v3382_v52  ;;  %v535_v53 = vsel %vm527_vm1, %v3382_v52, 0 }
 0x10c   :  { %v386_v54 = vpop.f32.mrb[4].mxu0  ;;  %2830 = vmatpush3.bf16.xpose.msra.mxu1 %v535_v53 }
 0x10d   :  { %v388_v55 = vpop.f32.mrb[5].mxu0  ;;  %v387_v57 = vadd.f32 %v3378_v45, %v386_v54 }
 0x10e   :  { %v389_v56 = vpop.f32.mrb[6].mxu0 }
 0x10f   :  { %v390_v58 = vadd.f32 %v3378_v45, %v389_v56  ;;  %v391_v59 = vpop.f32.mrb[7].mxu0 }
 0x111   :  { %v3392_v60 = vpack.c.bf16 %v390_v58, %v387_v57 }
 0x113   :  { %525 = vrot.lane.b32.xlu0 %v3392_v60, %s3197_s1  ;;  %2958 = vmatprep.subr.msk.bf16.mxu1 %vm527_vm1, %v3392_v60  ;;  %v538_v61 = vsel %vm527_vm1, %v3392_v60, 0 }
 0x114   :  { %v394_v62 = vpop.f32.mrb[8].mxu0  ;;  %2832 = vmatpush3.bf16.xpose.msra.mxu1 %v538_v61 }
 0x115   :  { %v396_v63 = vpop.f32.mrb[9].mxu0  ;;  %v395_v1 = vadd.f32 %v3378_v45, %v394_v62 }
 0x116   :  { %v397_v0 = vpop.f32.mrb[10].mxu0 }
 0x117   :  { %v398_v2 = vadd.f32 %v3378_v45, %v397_v0  ;;  %v399_v3 = vpop.f32.mrb[11].mxu0 }
 0x119   :  { %v3402_v4 = vpack.c.bf16 %v398_v2, %v395_v1 }
 0x11b   :  { %591 = vrot.lane.b32.xlu1 %v3402_v4, %s3197_s1  ;;  %2959 = vmatprep.subr.msk.bf16.mxu1 %vm527_vm1, %v3402_v4 }
 0x11c   :  { %v402_v5 = vpop.f32.mrb[12].mxu0 }
 0x11d   :  { %v404_v6 = vpop.f32.mrb[13].mxu0  ;;  %v403_v8 = vadd.f32 %v3378_v45, %v402_v5 }
 0x11e   :  { %v405_v7 = vpop.f32.mrb[14].mxu0 }
 0x11f   :  { %v406_v9 = vadd.f32 %v3378_v45, %v405_v7  ;;  %v407_v10 = vpop.f32.mrb[15].mxu0 }
 0x121   :  { %v3410_v11 = vpack.c.bf16 %v406_v9, %v403_v8 }
 0x123   :  { %593 = vrot.lane.b32.xlu1 %v3410_v11, %s3197_s1 }
 0x124   :  { %v410_v12 = vpop.f32.mrb[16].mxu0 }
 0x125   :  { %v412_v13 = vpop.f32.mrb[17].mxu0  ;;  %v411_v15 = vadd.f32 %v3378_v45, %v410_v12 }
 0x126   :  { %v413_v14 = vpop.f32.mrb[18].mxu0 }
 0x127   :  { %v414_v16 = vadd.f32 %v3378_v45, %v413_v14  ;;  %v415_v17 = vpop.f32.mrb[19].mxu0 }
 0x129   :  { %v3416_v18 = vpack.c.bf16 %v414_v16, %v411_v15 }
 0x12b   :  { %658 = vrot.lane.b32.xlu0 %v3416_v18, %s3197_s1 }
 0x12c   :  { %v418_v19 = vpop.f32.mrb[20].mxu0 }
 0x12d   :  { %v420_v20 = vpop.f32.mrb[21].mxu0  ;;  %v419_v22 = vadd.f32 %v3378_v45, %v418_v19 }
 0x12e   :  { %v421_v21 = vpop.f32.mrb[22].mxu0 }
 0x12f   :  { %v422_v23 = vadd.f32 %v3378_v45, %v421_v21  ;;  %v423_v24 = vpop.f32.mrb[23].mxu0 }
 0x131   :  { %v3422_v25 = vpack.c.bf16 %v422_v23, %v419_v22 }
 0x133   :  { %660 = vrot.lane.b32.xlu1 %v3422_v25, %s3197_s1 }
 0x134   :  { %v426_v26 = vpop.f32.mrb[24].mxu0 }
 0x135   :  { %v428_v27 = vpop.f32.mrb[25].mxu0  ;;  %v427_v29 = vadd.f32 %v3378_v45, %v426_v26 }
 0x136   :  { %v429_v28 = vpop.f32.mrb[26].mxu0 }
 0x137   :  { %v430_v30 = vadd.f32 %v3378_v45, %v429_v28  ;;  %v431_v31 = vpop.f32.mrb[27].mxu0 }
 0x139   :  { %v3428_v32 = vpack.c.bf16 %v430_v30, %v427_v29 }
 0x13b   :  { %725 = vrot.lane.b32.xlu0 %v3428_v32, %s3197_s1 }
 0x13c   :  { %v434_v33 = vpop.f32.mrb[28].mxu0 }
 0x13d   :  { %v436_v34 = vpop.f32.mrb[29].mxu0  ;;  %v435_v36 = vadd.f32 %v3378_v45, %v434_v33 }
 0x13e   :  { %v437_v35 = vpop.f32.mrb[30].mxu0 }
 0x13f   :  { %v438_v37 = vadd.f32 %v3378_v45, %v437_v35  ;;  %v439_v38 = vpop.f32.mrb[31].mxu0 }
 0x141   :  { %v3434_v39 = vpack.c.bf16 %v438_v37, %v435_v36 }
 0x143   :  { %727 = vrot.lane.b32.xlu1 %v3434_v39, %s3197_s1 }
 0x144   :  { %v442_v40 = vpop.f32.mrb[32].mxu0 }
 0x145   :  { %v444_v41 = vpop.f32.mrb[33].mxu0  ;;  %v443_v43 = vadd.f32 %v3378_v45, %v442_v40 }
 0x146   :  { %v445_v42 = vpop.f32.mrb[34].mxu0 }
 0x147   :  { %v446_v44 = vadd.f32 %v3378_v45, %v445_v42  ;;  %v447_v46 = vpop.f32.mrb[35].mxu0 }
 0x148   :  { %v736_v46 = vsel %vm527_vm1, %v3428_v32, 0 }
 0x149   :  { %v3440_v47 = vpack.c.bf16 %v446_v44, %v443_v43  ;;  %v602_v43 = vsel %vm527_vm1, %v3402_v4, 0  ;;  %v672_v44 = vsel %vm527_vm1, %v3422_v25, 0 }
 0x14b   :  { %792 = vrot.lane.b32.xlu0 %v3440_v47, %s3197_s1 }
 0x14c   :  { %v450_v48 = vpop.f32.mrb[36].mxu0 }
 0x14d   :  { %v452_v49 = vpop.f32.mrb[37].mxu0  ;;  %v451_v51 = vadd.f32 %v3378_v45, %v450_v48  ;;  %v739_v48 = vsel %vm527_vm1, %v3434_v39, 0 }
 0x14e   :  { %v453_v50 = vpop.f32.mrb[38].mxu0 }
 0x14f   :  { %v454_v53 = vadd.f32 %v3378_v45, %v453_v50  ;;  %v455_v54 = vpop.f32.mrb[39].mxu0 }
 0x151   :  { %v3446_v55 = vpack.c.bf16 %v454_v53, %v451_v51 }
 0x153   :  { %794 = vrot.lane.b32.xlu1 %v3446_v55, %s3197_s1 }
 0x154   :  { %v458_v56 = vpop.f32.mrb[40].mxu0 }
 0x155   :  { %v460_v57 = vpop.f32.mrb[41].mxu0  ;;  %v459_v59 = vadd.f32 %v3378_v45, %v458_v56 }
 0x156   :  { %v461_v58 = vpop.f32.mrb[42].mxu0 }
 0x157   :  { %v462_v61 = vadd.f32 %v3378_v45, %v461_v58  ;;  %v463_v62 = vpop.f32.mrb[43].mxu0 }
 0x159   :  { %v3452_v63 = vpack.c.bf16 %v462_v61, %v459_v59 }
 0x15b   :  { %859 = vrot.lane.b32.xlu0 %v3452_v63, %s3197_s1 }
 0x15c   :  { %v466_v0 = vpop.f32.mrb[44].mxu0 }
 0x15d   :  { %v468_v1 = vpop.f32.mrb[45].mxu0  ;;  %v467_v3 = vadd.f32 %v3378_v45, %v466_v0 }
 0x15e   :  { %v469_v2 = vpop.f32.mrb[46].mxu0 }
 0x15f   :  { %v470_v5 = vadd.f32 %v3378_v45, %v469_v2  ;;  %v471_v6 = vpop.f32.mrb[47].mxu0 }
 0x161   :  { %v3458_v7 = vpack.c.bf16 %v470_v5, %v467_v3 }
 0x163   :  { %861 = vrot.lane.b32.xlu1 %v3458_v7, %s3197_s1  ;;  %v873_v54 = vsel %vm527_vm1, %v3458_v7, 0 }
 0x164   :  { %v474_v8 = vpop.f32.mrb[48].mxu0 }
 0x165   :  { %v476_v9 = vpop.f32.mrb[49].mxu0  ;;  %v475_v12 = vadd.f32 %v3378_v45, %v474_v8 }
 0x166   :  { %v477_v10 = vpop.f32.mrb[50].mxu0 }
 0x167   :  { %v478_v13 = vadd.f32 %v3378_v45, %v477_v10  ;;  %v479_v14 = vpop.f32.mrb[51].mxu0  ;;  %v1058_v10 = vlaneseq }
 0x169   :  { %v3464_v15 = vpack.c.bf16 %v478_v13, %v475_v12  ;;  %v3589_v12 = vshrl.u32 %v1058_v10, 7  ;;  %v1064_v14 = vand.u32 127, %v1058_v10 }
 0x16b   :  { %926 = vrot.lane.b32.xlu0 %v3464_v15, %s3197_s1  ;;  %v937_v56 = vsel %vm527_vm1, %v3464_v15, 0  ;;  %v1061_v13 = vadd.s32 16, %v3589_v12  ;;  %vm3598_vm4 = vcmp.le.s32.totalorder %v1064_v14, %v3589_v12 }
 0x16c   :  { %v482_v16 = vpop.f32.mrb[52].mxu0 }
 0x16d   :  { %v484_v17 = vpop.f32.mrb[53].mxu0  ;;  %v483_v20 = vadd.f32 %v3378_v45, %v482_v16  ;;  %v1060_v16 = vadd.s32 8, %v3589_v12  ;;  %vm3593_vm2 = vcmp.le.s32.totalorder %v1064_v14, %v1061_v13 }
 0x16e   :  { %v485_v19 = vpop.f32.mrb[54].mxu0 }
 0x16f   :  { %v486_v21 = vadd.f32 %v3378_v45, %v485_v19  ;;  %v487_v22 = vpop.f32.mrb[55].mxu0  ;;  %vm3607_vm5 = vcmp.le.s32.totalorder %v1064_v14, %v1060_v16 }
 0x171   :  { %v3470_v23 = vpack.c.bf16 %v486_v21, %v483_v20  ;;  %v1062_v21 = vadd.s32 24, %v3589_v12 }
 0x173   :  { %928 = vrot.lane.b32.xlu1 %v3470_v23, %s3197_s1  ;;  %v940_v58 = vsel %vm527_vm1, %v3470_v23, 0  ;;  %vm3617_vm6 = vcmp.le.s32.totalorder %v1064_v14, %v1062_v21 }
 0x174   :  { %v490_v24 = vpop.f32.mrb[56].mxu0 }
 0x175   :  { %v492_v26 = vpop.f32.mrb[57].mxu0  ;;  %v491_v28 = vadd.f32 %v3378_v45, %v490_v24 }
 0x176   :  { %v493_v27 = vpop.f32.mrb[58].mxu0 }
 0x177   :  { %v494_v29 = vadd.f32 %v3378_v45, %v493_v27  ;;  %v495_v30 = vpop.f32.mrb[59].mxu0 }
 0x179   :  { %v3476_v31 = vpack.c.bf16 %v494_v29, %v491_v28 }
 0x17b   :  { %993 = vrot.lane.b32.xlu0 %v3476_v31, %s3197_s1  ;;  %v1004_v61 = vsel %vm527_vm1, %v3476_v31, 0 }
 0x17c   :  { %v498_v33 = vpop.f32.mrb[60].mxu0 }
 0x17d   :  { %v500_v34 = vpop.f32.mrb[61].mxu0  ;;  %v524_v35 = vpop.permute.xlu0 %523  ;;  %v499_v37 = vadd.f32 %v3378_v45, %v498_v33 }
 0x17e   :  { %v501_v36 = vpop.f32.mrb[62].mxu0  ;;  %2833 = vmatprep.mubr.msk.bf16.mxu1 %vm527_vm1, %v524_v35 }
 0x17f   :  { %v502_v38 = vadd.f32 %v3378_v45, %v501_v36  ;;  %v503_v40 = vpop.f32.mrb[63].mxu0  ;;  %1539 = vrot.lane.b32.xlu0 %v3402_v4, %s3198_s0  ;;  %v605_v4 = vsel %vm527_vm1, %v3410_v11, 0 }
 0x181   :  { %v3485_v41 = vpack.c.bf16 %v502_v38, %v499_v37 }
 0x183   :  { %995 = vrot.lane.b32.xlu1 %v3485_v41, %s3197_s1  ;;  %1541 = vrot.lane.b32.xlu0 %v3410_v11, %s3198_s0 }
 0x185   :  { %v526_v42 = vpop.permute.xlu0 %525 }
 0x186   :  { %2834 = vmatmul.mubr.msk.bf16.vlgmr.msra.gmra.mrb[0].mxu1 %vm527_vm1, %v526_v42 }
 0x187   :  { %2838 = vmatpush3.bf16.xpose.msra.mxu1 %v602_v43  ;;  %1478 = vrot.lane.b32.xlu1 %v3382_v52, %s3198_s0 }
 0x188   :  { %1602 = vrot.lane.b32.xlu0 %v3422_v25, %s3198_s0  ;;  %2960 = vmatprep.subr.msk.bf16.mxu1 %vm527_vm1, %v3410_v11 }
 0x18b   :  { %1480 = vrot.lane.b32.xlu1 %v3392_v60, %s3198_s0  ;;  %v669_v60 = vsel %vm527_vm1, %v3416_v18, 0 }
 0x18c   :  { %1722 = vrot.lane.b32.xlu0 %v3440_v47, %s3198_s0 }
 0x18d   :  { %v592_v45 = vpop.permute.xlu1 %591 }
 0x18e   :  { %2841 = vmatprep.mubr.msk.bf16.mxu1 %vm527_vm1, %v592_v45 }
 0x18f   :  { %2840 = vmatpush3.bf16.xpose.msra.mxu1 %v605_v4  ;;  %1600 = vrot.lane.b32.xlu1 %v3416_v18, %s3198_s0 }
 0x190   :  { %1724 = vrot.lane.b32.xlu0 %v3446_v55, %s3198_s0  ;;  %2961 = vmatprep.subr.msk.bf16.mxu1 %vm527_vm1, %v3416_v18 }
 0x193   :  { %1661 = vrot.lane.b32.xlu1 %v3428_v32, %s3198_s0 }
 0x195   :  { %v594_v52 = vpop.permute.xlu1 %593 }
 0x196   :  { %2842 = vmatmul.mubr.msk.bf16.vlgmr.msra.gmra.mrb[4].mxu1 %vm527_vm1, %v594_v52 }
 0x197   :  { %2846 = vmatpush3.bf16.xpose.msra.mxu1 %v669_v60  ;;  %1663 = vrot.lane.b32.xlu1 %v3434_v39, %s3198_s0 }
 0x198   :  { %2962 = vmatprep.subr.msk.bf16.mxu1 %vm527_vm1, %v3422_v25 }
 0x19b   :  { %1783 = vrot.lane.b32.xlu1 %v3452_v63, %s3198_s0 }
 0x19d   :  { %v659_v11 = vpop.permute.xlu0 %658 }
 0x19e   :  { %2849 = vmatprep.mubr.msk.bf16.mxu1 %vm527_vm1, %v659_v11 }
 0x19f   :  { %2848 = vmatpush3.bf16.xpose.msra.mxu1 %v672_v44  ;;  %1785 = vrot.lane.b32.xlu1 %v3458_v7, %s3198_s0 }
 0x1a0   :  { %2963 = vmatprep.subr.msk.bf16.mxu1 %vm527_vm1, %v3428_v32  ;;  %v803_v32 = vsel %vm527_vm1, %v3440_v47, 0 }
 0x1a5   :  { %v661_v18 = vpop.permute.xlu1 %660 }
 0x1a6   :  { %2850 = vmatmul.mubr.msk.bf16.vlgmr.msra.gmra.mrb[8].mxu1 %vm527_vm1, %v661_v18 }
 0x1a7   :  { %2854 = vmatpush3.bf16.xpose.msra.mxu1 %v736_v46 }
 0x1a8   :  { %2964 = vmatprep.subr.msk.bf16.mxu1 %vm527_vm1, %v3434_v39  ;;  %v806_v39 = vsel %vm527_vm1, %v3446_v55, 0 }
 0x1ad   :  { %v726_v25 = vpop.permute.xlu0 %725 }
 0x1ae   :  { %2857 = vmatprep.mubr.msk.bf16.mxu1 %vm527_vm1, %v726_v25 }
 0x1af   :  { %2856 = vmatpush3.bf16.xpose.msra.mxu1 %v739_v48 }
 0x1b0   :  { %2965 = vmatprep.subr.msk.bf16.mxu1 %vm527_vm1, %v3440_v47  ;;  %v870_v47 = vsel %vm527_vm1, %v3452_v63, 0 }
 0x1b5   :  { %v728_v49 = vpop.permute.xlu1 %727 }
 0x1b6   :  { %2858 = vmatmul.mubr.msk.bf16.vlgmr.msra.gmra.mrb[12].mxu1 %vm527_vm1, %v728_v49 }
 0x1b7   :  { %2862 = vmatpush3.bf16.xpose.msra.mxu1 %v803_v32 }
 0x1b8   :  { %2966 = vmatprep.subr.msk.bf16.mxu1 %vm527_vm1, %v3446_v55 }
 0x1bd   :  { %v793_v50 = vpop.permute.xlu0 %792 }
 0x1be   :  { %2865 = vmatprep.mubr.msk.bf16.mxu1 %vm527_vm1, %v793_v50 }
 0x1bf   :  { %2864 = vmatpush3.bf16.xpose.msra.mxu1 %v806_v39 }
 0x1c0   :  { %2967 = vmatprep.subr.msk.bf16.mxu1 %vm527_vm1, %v3452_v63  ;;  %v1007_v63 = vsel %vm527_vm1, %v3485_v41, 0 }
 0x1c5   :  { %v795_v51 = vpop.permute.xlu1 %794 }
 0x1c6   :  { %2866 = vmatmul.mubr.msk.bf16.vlgmr.msra.gmra.mrb[16].mxu1 %vm527_vm1, %v795_v51 }
 0x1c7   :  { %2870 = vmatpush3.bf16.xpose.msra.mxu1 %v870_v47 }
 0x1c8   :  { %2968 = vmatprep.subr.msk.bf16.mxu1 %vm527_vm1, %v3458_v7 }
 0x1cd   :  { %v860_v53 = vpop.permute.xlu0 %859 }
 0x1ce   :  { %2873 = vmatprep.mubr.msk.bf16.mxu1 %vm527_vm1, %v860_v53 }
 0x1cf   :  { %2872 = vmatpush3.bf16.xpose.msra.mxu1 %v873_v54 }
 0x1d0   :  { %2969 = vmatprep.subr.msk.bf16.mxu1 %vm527_vm1, %v3464_v15 }
 0x1d5   :  { %v862_v55 = vpop.permute.xlu1 %861 }
 0x1d6   :  { %2874 = vmatmul.mubr.msk.bf16.vlgmr.msra.gmra.mrb[20].mxu1 %vm527_vm1, %v862_v55 }
 0x1d7   :  { %2878 = vmatpush3.bf16.xpose.msra.mxu1 %v937_v56 }
 0x1d8   :  { %2970 = vmatprep.subr.msk.bf16.mxu1 %vm527_vm1, %v3470_v23 }
 0x1dd   :  { %v927_v57 = vpop.permute.xlu0 %926 }
 0x1de   :  { %2881 = vmatprep.mubr.msk.bf16.mxu1 %vm527_vm1, %v927_v57 }
 0x1df   :  { %2880 = vmatpush3.bf16.xpose.msra.mxu1 %v940_v58 }
 0x1e0   :  { %2971 = vmatprep.subr.msk.bf16.mxu1 %vm527_vm1, %v3476_v31 }
 0x1e5   :  { %v929_v59 = vpop.permute.xlu1 %928 }
 0x1e6   :  { %2882 = vmatmul.mubr.msk.bf16.vlgmr.msra.gmra.mrb[24].mxu1 %vm527_vm1, %v929_v59 }
 0x1e7   :  { %2886 = vmatpush3.bf16.xpose.msra.mxu1 %v1004_v61 }
 0x1e8   :  { %2972 = vmatprep.subr.msk.bf16.mxu1 %vm527_vm1, %v3485_v41 }
 0x1ed   :  { %v994_v62 = vpop.permute.xlu0 %993 }
 0x1ee   :  { %2889 = vmatprep.mubr.msk.bf16.mxu1 %vm527_vm1, %v994_v62 }
 0x1ef   :  { %2888 = vmatpush3.bf16.xpose.msra.mxu1 %v1007_v63 }
 0x1f1   :  { %v3580_v3 = vpop.permute.xlu0 %1539 }
 0x1f5   :  { %v996_v0 = vpop.permute.xlu1 %995  ;;  %v3803_v33 = vpop.permute.xlu0 %1541 }
 0x1f6   :  { %2890 = vmatmul.mubr.msk.bf16.vlgmr.msra.gmra.mrb[28].mxu1 %vm527_vm1, %v996_v0 }
 0x1f9   :  { %v1479_v1 = vpop.permute.xlu1 %1478 }
 0x1fa   :  { %2893 = vmatprep.subr.bf16.mxu1 %v1479_v1 }
 0x1fb   :  { %2894 = vmatpush3.bf16.msra.mxu1 %v1479_v1 }
 0x1fd   :  { %v1481_v2 = vpop.permute.xlu1 %1480 }
 0x1fe   :  { %2895 = vmatprep.subr.bf16.mxu1 %v1481_v2 }
 0x1ff   :  { %2896 = vmatpush3.bf16.msra.mxu1 %v1481_v2 }
 0x200   :  { %2901 = vmatprep.subr.bf16.mxu1 %v3580_v3 }
 0x201   :  { %v3583_v5 = vpop.permute.xlu1 %1600 }
 0x205   :  { %v3585_v6 = vpop.permute.xlu1 %1661 }
 0x209   :  { %v3587_v7 = vpop.permute.xlu1 %1663 }
 0x20d   :  { %v1784_v8 = vpop.permute.xlu1 %1783 }
 0x20e   :  { %2933 = vmatprep.subr.bf16.mxu0 %v1784_v8 }
 0x20f   :  { %2934 = vmatpush3.bf16.msra.mxu0 %v1784_v8 }
 0x211   :  { %v1786_v9 = vpop.permute.xlu1 %1785 }
 0x212   :  { %2935 = vmatprep.subr.bf16.mxu0 %v1786_v9 }
 0x213   :  { %2936 = vmatpush3.bf16.msra.mxu0 %v1786_v9 }
 0x259   :  { %v2835_v19 = vpop.f32.mrb[0].mxu1 }
 0x25a   :  { %v3605_v22 = vsel %vm3593_vm2, %v2835_v19, -inf  ;;  %v574_v24 = vpop.f32.mrb[1].mxu1 }
 0x25b   :  { %v2836_v27 = vpop.f32.mrb[2].mxu1  ;;  %v1116_v28 = vsel %vm1109_vm3, %v3605_v22, -inf  ;;  %v3615_v29 = vsel %vm3598_vm4, %v574_v24, -inf }
 0x25c   :  { %1117 = vmax.xlane.f32.xlu0 %v1116_v28  ;;  %v577_v30 = vpop.f32.mrb[3].mxu1  ;;  %v1110_v36 = vsel %vm1109_vm3, %v3615_v29, -inf  ;;  %v3631_v37 = vsel %vm3617_vm6, %v2836_v27, -inf }
 0x25d   :  { %v3623_v34 = vsel %vm3607_vm5, %v577_v30, -inf  ;;  %v1119_v38 = vsel %vm1109_vm3, %v3631_v37, -inf }
 0x25e   :  { %v1113_v35 = vsel %vm1109_vm3, %v3623_v34, -inf }
 0x25f   :  { %1114 = vmax.xlane.f32.xlu1 %v1113_v35 }
 0x260   :  { %1111 = vmax.xlane.f32.xlu0 %v1110_v36 }
 0x264   :  { %1120 = vmax.xlane.f32.xlu0 %v1119_v38 }
 0x269   :  { %v2843_v40 = vpop.f32.mrb[4].mxu1 }
 0x26a   :  { %v3637_v42 = vsel %vm3593_vm2, %v2843_v40, -inf  ;;  %v641_v43 = vpop.f32.mrb[5].mxu1 }
 0x26b   :  { %v2844_v45 = vpop.f32.mrb[6].mxu1  ;;  %v1128_v4 = vsel %vm1109_vm3, %v3637_v42, -inf  ;;  %v3643_v52 = vsel %vm3598_vm4, %v641_v43, -inf }
 0x26c   :  { %v3647_v60 = vsel %vm3617_vm6, %v2844_v45, -inf  ;;  %1129 = vmax.xlane.f32.xlu1 %v1128_v4  ;;  %v644_v11 = vpop.f32.mrb[7].mxu1  ;;  %v1122_v46 = vsel %vm1109_vm3, %v3643_v52, -inf }
 0x26d   :  { %v1131_v44 = vsel %vm1109_vm3, %v3647_v60, -inf  ;;  %v3653_v18 = vsel %vm3607_vm5, %v644_v11, -inf }
 0x26e   :  { %1132 = vmax.xlane.f32.xlu0 %v1131_v44  ;;  %v1125_v25 = vsel %vm1109_vm3, %v3653_v18, -inf }
 0x270   :  { %1123 = vmax.xlane.f32.xlu1 %v1122_v46 }
 0x272   :  { %1126 = vmax.xlane.f32.xlu0 %v1125_v25 }
 0x279   :  { %v2851_v48 = vpop.f32.mrb[8].mxu1 }
 0x27a   :  { %v3661_v49 = vsel %vm3593_vm2, %v2851_v48, -inf  ;;  %v708_v32 = vpop.f32.mrb[9].mxu1 }
 0x27b   :  { %v2852_v50 = vpop.f32.mrb[10].mxu1  ;;  %v1140_v39 = vsel %vm1109_vm3, %v3661_v49, -inf  ;;  %v3667_v51 = vsel %vm3598_vm4, %v708_v32, -inf }
 0x27c   :  { %v3671_v47 = vsel %vm3617_vm6, %v2852_v50, -inf  ;;  %1141 = vmax.xlane.f32.xlu1 %v1140_v39  ;;  %v711_v53 = vpop.f32.mrb[11].mxu1  ;;  %v1134_v56 = vsel %vm1109_vm3, %v3667_v51, -inf }
 0x27d   :  { %v1143_v54 = vsel %vm1109_vm3, %v3671_v47, -inf  ;;  %v3677_v55 = vsel %vm3607_vm5, %v711_v53, -inf }
 0x27e   :  { %1144 = vmax.xlane.f32.xlu0 %v1143_v54  ;;  %v1137_v57 = vsel %vm1109_vm3, %v3677_v55, -inf }
 0x280   :  { %1135 = vmax.xlane.f32.xlu1 %v1134_v56 }
 0x282   :  { %1138 = vmax.xlane.f32.xlu0 %v1137_v57 }
 0x289   :  { %v2859_v58 = vpop.f32.mrb[12].mxu1 }
 0x28a   :  { %v3685_v59 = vsel %vm3593_vm2, %v2859_v58, -inf  ;;  %v775_v61 = vpop.f32.mrb[13].mxu1 }
 0x28b   :  { %v2860_v62 = vpop.f32.mrb[14].mxu1  ;;  %v1152_v63 = vsel %vm1109_vm3, %v3685_v59, -inf  ;;  %v3691_v0 = vsel %vm3598_vm4, %v775_v61, -inf }
 0x28c   :  { %v3695_v1 = vsel %vm3617_vm6, %v2860_v62, -inf  ;;  %1153 = vmax.xlane.f32.xlu1 %v1152_v63  ;;  %v778_v2 = vpop.f32.mrb[15].mxu1  ;;  %v1146_v10 = vsel %vm1109_vm3, %v3691_v0, -inf }
 0x28d   :  { %v1155_v8 = vsel %vm1109_vm3, %v3695_v1, -inf  ;;  %v3701_v9 = vsel %vm3607_vm5, %v778_v2, -inf }
 0x28e   :  { %1156 = vmax.xlane.f32.xlu0 %v1155_v8  ;;  %v1149_v13 = vsel %vm1109_vm3, %v3701_v9, -inf }
 0x290   :  { %1147 = vmax.xlane.f32.xlu1 %v1146_v10 }
 0x292   :  { %1150 = vmax.xlane.f32.xlu0 %v1149_v13 }
 0x299   :  { %v2867_v14 = vpop.f32.mrb[16].mxu1 }
 0x29a   :  { %v3709_v16 = vsel %vm3593_vm2, %v2867_v14, -inf  ;;  %v842_v19 = vpop.f32.mrb[17].mxu1 }
 0x29b   :  { %v2868_v21 = vpop.f32.mrb[18].mxu1  ;;  %v1164_v24 = vsel %vm1109_vm3, %v3709_v16, -inf  ;;  %v3715_v27 = vsel %vm3598_vm4, %v842_v19, -inf }
 0x29c   :  { %v3719_v28 = vsel %vm3617_vm6, %v2868_v21, -inf  ;;  %1165 = vmax.xlane.f32.xlu1 %v1164_v24  ;;  %v845_v30 = vpop.f32.mrb[19].mxu1  ;;  %v1158_v38 = vsel %vm1109_vm3, %v3715_v27, -inf }
 0x29d   :  { %v1167_v35 = vsel %vm1109_vm3, %v3719_v28, -inf  ;;  %v3725_v36 = vsel %vm3607_vm5, %v845_v30, -inf }
 0x29e   :  { %1168 = vmax.xlane.f32.xlu0 %v1167_v35  ;;  %v1161_v40 = vsel %vm1109_vm3, %v3725_v36, -inf }
 0x2a0   :  { %1159 = vmax.xlane.f32.xlu1 %v1158_v38 }
 0x2a2   :  { %1162 = vmax.xlane.f32.xlu0 %v1161_v40 }
 0x2a9   :  { %v2875_v43 = vpop.f32.mrb[20].mxu1 }
 0x2aa   :  { %v3733_v45 = vsel %vm3593_vm2, %v2875_v43, -inf  ;;  %v909_v4 = vpop.f32.mrb[21].mxu1 }
 0x2ab   :  { %v2876_v11 = vpop.f32.mrb[22].mxu1  ;;  %v1176_v44 = vsel %vm1109_vm3, %v3733_v45, -inf  ;;  %v3739_v46 = vsel %vm3598_vm4, %v909_v4, -inf }
 0x2ac   :  { %v3743_v25 = vsel %vm3617_vm6, %v2876_v11, -inf  ;;  %1177 = vmax.xlane.f32.xlu1 %v1176_v44  ;;  %v912_v48 = vpop.f32.mrb[23].mxu1  ;;  %v1170_v39 = vsel %vm1109_vm3, %v3739_v46, -inf  ;;  %v3805_v44 = vpop.permute.xlu0 %1602 }
 0x2ad   :  { %v1179_v32 = vsel %vm1109_vm3, %v3743_v25, -inf  ;;  %v3749_v50 = vsel %vm3607_vm5, %v912_v48, -inf }
 0x2ae   :  { %1180 = vmax.xlane.f32.xlu0 %v1179_v32  ;;  %v1173_v53 = vsel %vm1109_vm3, %v3749_v50, -inf }
 0x2b0   :  { %1171 = vmax.xlane.f32.xlu1 %v1170_v39  ;;  %v3807_v48 = vpop.permute.xlu0 %1722 }
 0x2b2   :  { %1174 = vmax.xlane.f32.xlu0 %v1173_v53 }
 0x2b4   :  { %v3811_v26 = vpop.permute.xlu0 %1724 }
 0x2b9   :  { %v2883_v54 = vpop.f32.mrb[24].mxu1 }
 0x2ba   :  { %v3757_v56 = vsel %vm3593_vm2, %v2883_v54, -inf  ;;  %v976_v57 = vpop.f32.mrb[25].mxu1 }
 0x2bb   :  { %v2884_v58 = vpop.f32.mrb[26].mxu1  ;;  %v1188_v61 = vsel %vm1109_vm3, %v3757_v56, -inf  ;;  %v3763_v62 = vsel %vm3598_vm4, %v976_v57, -inf }
 0x2bc   :  { %v3767_v63 = vsel %vm3617_vm6, %v2884_v58, -inf  ;;  %1189 = vmax.xlane.f32.xlu1 %v1188_v61  ;;  %v979_v2 = vpop.f32.mrb[27].mxu1  ;;  %v1182_v13 = vsel %vm1109_vm3, %v3763_v62, -inf }
 0x2bd   :  { %v1191_v8 = vsel %vm1109_vm3, %v3767_v63, -inf  ;;  %v3773_v10 = vsel %vm3607_vm5, %v979_v2, -inf }
 0x2be   :  { %1192 = vmax.xlane.f32.xlu0 %v1191_v8  ;;  %v1185_v14 = vsel %vm1109_vm3, %v3773_v10, -inf }
 0x2c0   :  { %1183 = vmax.xlane.f32.xlu1 %v1182_v13 }
 0x2c2   :  { %1186 = vmax.xlane.f32.xlu0 %v1185_v14 }
 0x2c9   :  { %v2891_v19 = vpop.f32.mrb[28].mxu1 }
 0x2ca   :  { %v3781_v21 = vsel %vm3593_vm2, %v2891_v19, -inf  ;;  %v1043_v24 = vpop.f32.mrb[29].mxu1 }
 0x2cb   :  { %v2892_v30 = vpop.f32.mrb[30].mxu1  ;;  %v1200_v35 = vsel %vm1109_vm3, %v3781_v21, -inf  ;;  %v3787_v38 = vsel %vm3598_vm4, %v1043_v24, -inf }
 0x2cc   :  { %v3791_v40 = vsel %vm3617_vm6, %v2892_v30, -inf  ;;  %1201 = vmax.xlane.f32.xlu1 %v1200_v35  ;;  %v1046_v43 = vpop.f32.mrb[31].mxu1  ;;  %v1194_v11 = vsel %vm1109_vm3, %v3787_v38, -inf }
 0x2cd   :  { %v1203_v17 = vsel %vm1109_vm3, %v3791_v40, -inf  ;;  %v3797_v4 = vsel %vm3607_vm5, %v1046_v43, -inf }
 0x2ce   :  { %1204 = vmax.xlane.f32.xlu0 %v1203_v17  ;;  %v1197_v20 = vsel %vm1109_vm3, %v3797_v4, -inf }
 0x2d0   :  { %1195 = vmax.xlane.f32.xlu1 %v1194_v11 }
 0x2d2   :  { %1198 = vmax.xlane.f32.xlu0 %v1197_v20 }
 0x2e1   :  { %1905 = vrot.lane.b32.xlu1 %v3476_v31, %s3198_s0 }
 0x2e8   :  { %1844 = vrot.lane.b32.xlu0 %v3464_v15, %s3198_s0 }
 0x2e9   :  { %v1118_v32 = vpop.xlane.xlu0 %1117 }
 0x2ea   :  { %v1208_v53 = vsub.f32 %v3605_v22, %v1118_v32 }
 0x2ec   :  { %v1115_v57 = vpop.xlane.xlu1 %1114  ;;  %v1242_v61 = vmul.f32 1.442695, %v1208_v53 }
 0x2ed   :  { %v1112_v39 = vpop.xlane.xlu0 %1111  ;;  %v1207_v8 = vsub.f32 %v3623_v34, %v1115_v57 }
 0x2ee   :  { %v1206_v2 = vsub.f32 %v3615_v29, %v1112_v39  ;;  %3044 = vpow2.f32 %v1242_v61 }
 0x2ef   :  { %v1240_v14 = vmul.f32 1.442695, %v1207_v8 }
 0x2f0   :  { %v1238_v31 = vmul.f32 1.442695, %v1206_v2 }
 0x2f1   :  { %v1121_v54 = vpop.xlane.xlu0 %1120 }
 0x2f2   :  { %v1209_v58 = vsub.f32 %v3631_v37, %v1121_v54 }
 0x2f4   :  { %v1244_v13 = vmul.f32 1.442695, %v1209_v58 }
 0x2f6   :  { %3046 = vpow2.f32 %v1244_v13 }
 0x2f7   :  { %3048 = vpow2.f32 %v1238_v31 }
 0x2f8   :  { %3050 = vpow2.f32 %v1240_v14  ;;  %v3823_v11 = vpop.eup %3044 }
 0x2f9   :  { %v1130_v19 = vpop.xlane.xlu1 %1129 }
 0x2fa   :  { %v1212_v15 = vsub.f32 %v3637_v42, %v1130_v19 }
 0x2fb   :  { %v1133_v24 = vpop.xlane.xlu0 %1132 }
 0x2fc   :  { %v1250_v22 = vmul.f32 1.442695, %v1212_v15  ;;  %v1213_v30 = vsub.f32 %v3647_v60, %v1133_v24  ;;  %v1308_v60 = vsel %vm1109_vm3, %v3823_v11, 0.0 }
 0x2fd   :  { %v1124_v37 = vpop.xlane.xlu1 %1123 }
 0x2fe   :  { %v1252_v35 = vmul.f32 1.442695, %v1213_v30  ;;  %v1210_v29 = vsub.f32 %v3643_v52, %v1124_v37  ;;  %3052 = vpow2.f32 %v1250_v22 }
 0x2ff   :  { %v1127_v34 = vpop.xlane.xlu0 %1126 }
 0x300   :  { %v1246_v43 = vmul.f32 1.442695, %v1210_v29  ;;  %v1211_v17 = vsub.f32 %v3653_v18, %v1127_v34  ;;  %3054 = vpow2.f32 %v1252_v35  ;;  %v3825_v42 = vpop.eup %3046 }
 0x301   :  { %v3829_v32 = vpop.eup %3048  ;;  %v1311_v52 = vsel %vm1109_vm3, %v3825_v42, 0.0 }
 0x302   :  { %v1248_v20 = vmul.f32 1.442695, %v1211_v17  ;;  %3056 = vpow2.f32 %v1246_v43  ;;  %v3833_v39 = vpop.eup %3050  ;;  %v1302_v18 = vsel %vm1109_vm3, %v3829_v32, 0.0 }
 0x303   :  { %v1305_v58 = vsel %vm1109_vm3, %v3833_v39, 0.0 }
 0x304   :  { %3058 = vpow2.f32 %v1248_v20 }
 0x305   :  { %1309 = vadd.xlane.f32.xlu1 %v1308_v60 }
 0x307   :  { %1312 = vadd.xlane.f32.xlu0 %v1311_v52 }
 0x308   :  { %v3837_v53 = vpop.eup %3052 }
 0x309   :  { %v1142_v54 = vpop.xlane.xlu1 %1141  ;;  %1303 = vadd.xlane.f32.xlu1 %v1302_v18  ;;  %v1320_v31 = vsel %vm1109_vm3, %v3837_v53, 0.0 }
 0x30a   :  { %v1216_v57 = vsub.f32 %v3661_v49, %v1142_v54  ;;  %v3842_v61 = vpop.eup %3054 }
 0x30b   :  { %v1145_v2 = vpop.xlane.xlu0 %1144  ;;  %1306 = vadd.xlane.f32.xlu0 %v1305_v58  ;;  %v1323_v24 = vsel %vm1109_vm3, %v3842_v61, 0.0 }
 0x30c   :  { %v1258_v8 = vmul.f32 1.442695, %v1216_v57  ;;  %v1217_v13 = vsub.f32 %v3671_v47, %v1145_v2  ;;  %v3847_v14 = vpop.eup %3056 }
 0x30d   :  { %v1136_v19 = vpop.xlane.xlu1 %1135  ;;  %1321 = vadd.xlane.f32.xlu1 %v1320_v31  ;;  %v1314_v35 = vsel %vm1109_vm3, %v3847_v14, 0.0 }
 0x30e   :  { %3060 = vpow2.f32 %v1258_v8  ;;  %v1260_v15 = vmul.f32 1.442695, %v1217_v13  ;;  %v1214_v49 = vsub.f32 %v3667_v51, %v1136_v19  ;;  %v3852_v22 = vpop.eup %3058 }
 0x30f   :  { %v1139_v30 = vpop.xlane.xlu0 %1138  ;;  %1324 = vadd.xlane.f32.xlu0 %v1323_v24  ;;  %v1317_v51 = vsel %vm1109_vm3, %v3852_v22, 0.0 }
 0x310   :  { %3062 = vpow2.f32 %v1260_v15  ;;  %v1254_v47 = vmul.f32 1.442695, %v1214_v49  ;;  %v1215_v37 = vsub.f32 %v3677_v55, %v1139_v30 }
 0x311   :  { %1315 = vadd.xlane.f32.xlu1 %v1314_v35 }
 0x312   :  { %3064 = vpow2.f32 %v1254_v47  ;;  %v1256_v29 = vmul.f32 1.442695, %v1215_v37 }
 0x313   :  { %1318 = vadd.xlane.f32.xlu0 %v1317_v51 }
 0x314   :  { %3066 = vpow2.f32 %v1256_v29 }
 0x318   :  { %v3859_v34 = vpop.eup %3060 }
 0x319   :  { %v1154_v43 = vpop.xlane.xlu1 %1153  ;;  %v1332_v17 = vsel %vm1109_vm3, %v3859_v34, 0.0 }
 0x31a   :  { %v3863_v20 = vpop.eup %3062  ;;  %v1220_v55 = vsub.f32 %v3685_v59, %v1154_v43  ;;  %1333 = vadd.xlane.f32.xlu1 %v1332_v17 }
 0x31b   :  { %v1157_v60 = vpop.xlane.xlu0 %1156  ;;  %v1335_v52 = vsel %vm1109_vm3, %v3863_v20, 0.0 }
 0x31c   :  { %v3868_v18 = vpop.eup %3064  ;;  %v1266_v54 = vmul.f32 1.442695, %v1220_v55  ;;  %v1221_v57 = vsub.f32 %v3695_v1, %v1157_v60  ;;  %1336 = vadd.xlane.f32.xlu0 %v1335_v52 }
 0x31d   :  { %v1148_v58 = vpop.xlane.xlu1 %1147  ;;  %v1326_v2 = vsel %vm1109_vm3, %v3868_v18, 0.0 }
 0x31e   :  { %v3873_v8 = vpop.eup %3066  ;;  %3068 = vpow2.f32 %v1266_v54  ;;  %v1218_v59 = vsub.f32 %v3691_v0, %v1148_v58  ;;  %1327 = vadd.xlane.f32.xlu1 %v1326_v2  ;;  %v1268_v19 = vmul.f32 1.442695, %v1221_v57 }
 0x31f   :  { %v1151_v13 = vpop.xlane.xlu0 %1150  ;;  %v1329_v31 = vsel %vm1109_vm3, %v3873_v8, 0.0 }
 0x320   :  { %v1262_v15 = vmul.f32 1.442695, %v1218_v59  ;;  %v1219_v49 = vsub.f32 %v3701_v9, %v1151_v13  ;;  %1330 = vadd.xlane.f32.xlu0 %v1329_v31 }
 0x322   :  { %3070 = vpow2.f32 %v1262_v15  ;;  %v1264_v1 = vmul.f32 1.442695, %v1219_v49 }
 0x323   :  { %3072 = vpow2.f32 %v1268_v19 }
 0x324   :  { %3074 = vpow2.f32 %v1264_v1 }
 0x328   :  { %v3879_v24 = vpop.eup %3068 }
 0x329   :  { %v1166_v30 = vpop.xlane.xlu1 %1165  ;;  %v1344_v0 = vsel %vm1109_vm3, %v3879_v24, 0.0 }
 0x32a   :  { %v1224_v47 = vsub.f32 %v3709_v16, %v1166_v30  ;;  %1345 = vadd.xlane.f32.xlu0 %v1344_v0 }
 0x32b   :  { %v1169_v37 = vpop.xlane.xlu0 %1168 }
 0x32c   :  { %v3884_v35 = vpop.eup %3070  ;;  %v1274_v29 = vmul.f32 1.442695, %v1224_v47  ;;  %v1225_v9 = vsub.f32 %v3719_v28, %v1169_v37 }
 0x32d   :  { %v1160_v51 = vpop.xlane.xlu1 %1159  ;;  %v1338_v43 = vsel %vm1109_vm3, %v3884_v35, 0.0  ;;  %v3889_v17 = vpop.eup %3072 }
 0x32e   :  { %3076 = vpow2.f32 %v1274_v29  ;;  %v1222_v55 = vsub.f32 %v3715_v27, %v1160_v51  ;;  %1339 = vadd.xlane.f32.xlu0 %v1338_v43  ;;  %v1276_v60 = vmul.f32 1.442695, %v1225_v9  ;;  %v1347_v57 = vsel %vm1109_vm3, %v3889_v17, 0.0  ;;  %v3895_v58 = vpop.eup %3074 }
 0x32f   :  { %v1163_v52 = vpop.xlane.xlu0 %1162  ;;  %v1341_v2 = vsel %vm1109_vm3, %v3895_v58, 0.0 }
 0x330   :  { %v1270_v16 = vmul.f32 1.442695, %v1222_v55  ;;  %v1223_v54 = vsub.f32 %v3725_v36, %v1163_v52 }
 0x332   :  { %3078 = vpow2.f32 %v1270_v16  ;;  %v1272_v28 = vmul.f32 1.442695, %v1223_v54  ;;  %1348 = vadd.xlane.f32.xlu0 %v1347_v57 }
 0x333   :  { %3080 = vpow2.f32 %v1276_v60 }
 0x334   :  { %3082 = vpow2.f32 %v1272_v28 }
 0x336   :  { %1342 = vadd.xlane.f32.xlu0 %v1341_v2 }
 0x338   :  { %v3899_v27 = vpop.eup %3076 }
 0x339   :  { %v1178_v59 = vpop.xlane.xlu1 %1177  ;;  %v1356_v36 = vsel %vm1109_vm3, %v3899_v27, 0.0 }
 0x33a   :  { %v1228_v13 = vsub.f32 %v3733_v45, %v1178_v59  ;;  %1357 = vadd.xlane.f32.xlu1 %v1356_v36 }
 0x33b   :  { %v1181_v31 = vpop.xlane.xlu0 %1180 }
 0x33c   :  { %v3904_v19 = vpop.eup %3078  ;;  %v1282_v15 = vmul.f32 1.442695, %v1228_v13  ;;  %v1229_v49 = vsub.f32 %v3743_v25, %v1181_v31 }
 0x33d   :  { %v3907_v1 = vpop.eup %3080  ;;  %v1172_v30 = vpop.xlane.xlu1 %1171  ;;  %v1350_v0 = vsel %vm1109_vm3, %v3904_v19, 0.0 }
 0x33e   :  { %v3911_v47 = vpop.eup %3082  ;;  %3084 = vpow2.f32 %v1282_v15  ;;  %v1226_v37 = vsub.f32 %v3739_v46, %v1172_v30  ;;  %1351 = vadd.xlane.f32.xlu1 %v1350_v0  ;;  %v1284_v9 = vmul.f32 1.442695, %v1229_v49  ;;  %v1359_v43 = vsel %vm1109_vm3, %v3907_v1, 0.0 }
 0x33f   :  { %v1175_v45 = vpop.xlane.xlu0 %1174  ;;  %v1353_v29 = vsel %vm1109_vm3, %v3911_v47, 0.0 }
 0x340   :  { %v1278_v51 = vmul.f32 1.442695, %v1226_v37  ;;  %v1227_v25 = vsub.f32 %v3749_v50, %v1175_v45  ;;  %1354 = vadd.xlane.f32.xlu0 %v1353_v29 }
 0x342   :  { %3086 = vpow2.f32 %v1278_v51  ;;  %1360 = vadd.xlane.f32.xlu1 %v1359_v43  ;;  %v1280_v55 = vmul.f32 1.442695, %v1227_v25 }
 0x343   :  { %3088 = vpow2.f32 %v1284_v9 }
 0x344   :  { %3090 = vpow2.f32 %v1280_v55 }
 0x348   :  { %v3919_v60 = vpop.eup %3084 }
 0x349   :  { %v1190_v46 = vpop.xlane.xlu1 %1189  ;;  %v1368_v52 = vsel %vm1109_vm3, %v3919_v60, 0.0 }
 0x34a   :  { %v1232_v16 = vsub.f32 %v3757_v56, %v1190_v46  ;;  %1369 = vadd.xlane.f32.xlu0 %v1368_v52 }
 0x34b   :  { %v1193_v54 = vpop.xlane.xlu0 %1192 }
 0x34c   :  { %v3924_v50 = vpop.eup %3086  ;;  %v1290_v57 = vmul.f32 1.442695, %v1232_v16  ;;  %v1233_v28 = vsub.f32 %v3767_v63, %v1193_v54 }
 0x34d   :  { %v1184_v2 = vpop.xlane.xlu1 %1183  ;;  %v1362_v59 = vsel %vm1109_vm3, %v3924_v50, 0.0  ;;  %v3929_v36 = vpop.eup %3088 }
 0x34e   :  { %3092 = vpow2.f32 %v1290_v57  ;;  %v1230_v13 = vsub.f32 %v3763_v62, %v1184_v2  ;;  %1363 = vadd.xlane.f32.xlu1 %v1362_v59  ;;  %v1292_v31 = vmul.f32 1.442695, %v1233_v28  ;;  %v1371_v30 = vsel %vm1109_vm3, %v3929_v36, 0.0  ;;  %v3935_v0 = vpop.eup %3090 }
 0x34f   :  { %v1187_v15 = vpop.xlane.xlu0 %1186  ;;  %v1365_v37 = vsel %vm1109_vm3, %v3935_v0, 0.0 }
 0x350   :  { %v1286_v56 = vmul.f32 1.442695, %v1230_v13  ;;  %v1231_v49 = vsub.f32 %v3773_v10, %v1187_v15 }
 0x352   :  { %3094 = vpow2.f32 %v1286_v56  ;;  %v1288_v63 = vmul.f32 1.442695, %v1231_v49  ;;  %1372 = vadd.xlane.f32.xlu1 %v1371_v30 }
 0x353   :  { %3096 = vpow2.f32 %v1292_v31 }
 0x354   :  { %3098 = vpow2.f32 %v1288_v63 }
 0x356   :  { %1366 = vadd.xlane.f32.xlu1 %v1365_v37 }
 0x358   :  { %v3939_v62 = vpop.eup %3092 }
 0x359   :  { %v1202_v45 = vpop.xlane.xlu1 %1201  ;;  %v1380_v10 = vsel %vm1109_vm3, %v3939_v62, 0.0 }
 0x35a   :  { %v1236_v29 = vsub.f32 %v3781_v21, %v1202_v45  ;;  %1381 = vadd.xlane.f32.xlu0 %v1380_v10 }
 0x35b   :  { %v1205_v9 = vpop.xlane.xlu0 %1204 }
 0x35c   :  { %v3944_v51 = vpop.eup %3094  ;;  %v1298_v25 = vmul.f32 1.442695, %v1236_v29  ;;  %v1237_v43 = vsub.f32 %v3791_v40, %v1205_v9 }
 0x35d   :  { %v3947_v55 = vpop.eup %3096  ;;  %v1196_v46 = vpop.xlane.xlu1 %1195  ;;  %v1374_v52 = vsel %vm1109_vm3, %v3944_v51, 0.0 }
 0x35e   :  { %v3951_v16 = vpop.eup %3098  ;;  %3100 = vpow2.f32 %v1298_v25  ;;  %v1300_v54 = vmul.f32 1.442695, %v1237_v43  ;;  %v1234_v57 = vsub.f32 %v3787_v38, %v1196_v46  ;;  %1375 = vadd.xlane.f32.xlu1 %v1374_v52  ;;  %v1383_v13 = vsel %vm1109_vm3, %v3947_v55, 0.0 }
 0x35f   :  { %v1199_v21 = vpop.xlane.xlu0 %1198  ;;  %v1377_v28 = vsel %vm1109_vm3, %v3951_v16, 0.0 }
 0x360   :  { %3102 = vpow2.f32 %v1300_v54  ;;  %v1294_v2 = vmul.f32 1.442695, %v1234_v57  ;;  %v1235_v40 = vsub.f32 %v3797_v4, %v1199_v21  ;;  %1378 = vadd.xlane.f32.xlu0 %v1377_v28 }
 0x361   :  { %v3957_v59 = vpop.permute.xlu1 %1905 }
 0x362   :  { %3104 = vpow2.f32 %v1294_v2  ;;  %v1296_v31 = vmul.f32 1.442695, %v1235_v40  ;;  %1384 = vadd.xlane.f32.xlu1 %v1383_v13  ;;  %2949 = vmatprep.subr.bf16.mxu0 %v3957_v59 }
 0x363   :  { %v3982_v45 = vpop.permute.xlu0 %1844 }
 0x364   :  { %3106 = vpow2.f32 %v1296_v31 }
 0x368   :  { %v3962_v38 = vpop.eup %3100 }
 0x369   :  { %v1392_v15 = vsel %vm1109_vm3, %v3962_v38, 0.0 }
 0x36a   :  { %v3966_v56 = vpop.eup %3102  ;;  %1393 = vadd.xlane.f32.xlu0 %v1392_v15 }
 0x36b   :  { %v1395_v4 = vsel %vm1109_vm3, %v3966_v56, 0.0 }
 0x36c   :  { %v3970_v49 = vpop.eup %3104  ;;  %1396 = vadd.xlane.f32.xlu1 %v1395_v4 }
 0x36d   :  { %v1386_v30 = vsel %vm1109_vm3, %v3970_v49, 0.0 }
 0x36e   :  { %v3974_v63 = vpop.eup %3106  ;;  %1387 = vadd.xlane.f32.xlu0 %v1386_v30 }
 0x36f   :  { %v1389_v37 = vsel %vm1109_vm3, %v3974_v63, 0.0 }
 0x370   :  { %1390 = vadd.xlane.f32.xlu1 %v1389_v37 }
 0x381   :  { %1907 = vrot.lane.b32.xlu1 %v3485_v41, %s3198_s0 }
 0x384   :  { %1846 = vrot.lane.b32.xlu0 %v3470_v23, %s3198_s0 }
 0x392   :  { %v1310_v10 = vpop.xlane.xlu1 %1309 }
 0x394   :  { %v1313_v29 = vpop.xlane.xlu0 %1312 }
 0x395   :  { %3108 = vrcp.f32 %v1313_v29 }
 0x396   :  { %v1304_v9 = vpop.xlane.xlu1 %1303 }
 0x397   :  { %3110 = vrcp.f32 %v1304_v9 }
 0x398   :  { %3112 = vrcp.f32 %v1310_v10  ;;  %v1307_v25 = vpop.xlane.xlu0 %1306 }
 0x399   :  { %3114 = vrcp.f32 %v1307_v25 }
 0x39a   :  { %v1322_v43 = vpop.xlane.xlu1 %1321 }
 0x39c   :  { %v1325_v46 = vpop.xlane.xlu0 %1324 }
 0x39d   :  { %3116 = vrcp.f32 %v1325_v46 }
 0x39e   :  { %v1316_v52 = vpop.xlane.xlu1 %1315 }
 0x39f   :  { %3118 = vrcp.f32 %v1316_v52  ;;  %v3109_v54 = vpop.eup %3108 }
 0x3a0   :  { %3120 = vrcp.f32 %v1322_v43  ;;  %v1319_v41 = vpop.xlane.xlu0 %1318  ;;  %v1433_v28 = vmul.f32 %v3109_v54, %v3825_v42 }
 0x3a1   :  { %v3111_v57 = vpop.eup %3110  ;;  %3122 = vrcp.f32 %v1319_v41 }
 0x3a2   :  { %v3113_v23 = vpop.eup %3112  ;;  %v1430_v2 = vmul.f32 %v3111_v57, %v3829_v32 }
 0x3a3   :  { %v3115_v21 = vpop.eup %3114  ;;  %v1432_v13 = vmul.f32 %v3113_v23, %v3823_v11 }
 0x3a4   :  { %v1431_v40 = vmul.f32 %v3115_v21, %v3833_v39 }
 0x3a5   :  { %v1463_v4 = vpack.c.bf16 %v1433_v28, %v1432_v13 }
 0x3a6   :  { %v1462_v31 = vpack.c.bf16 %v1431_v40, %v1430_v2 }
 0x3a7   :  { %v1334_v15 = vpop.xlane.xlu1 %1333  ;;  %v3117_v30 = vpop.eup %3116 }
 0x3a8   :  { %2897 = vmatprep.mubr.msk.bf16.mxu1 %vm1109_vm3, %v1462_v31  ;;  %v1437_v32 = vmul.f32 %v3117_v30, %v3842_v61 }
 0x3a9   :  { %v3119_v37 = vpop.eup %3118  ;;  %2898 = vmatmul.mubr.msk.bf16.vlgmr.msra.gmra.mrb[32].mxu1 %vm1109_vm3, %v1463_v4  ;;  %v1337_v10 = vpop.xlane.xlu0 %1336 }
 0x3aa   :  { %v3121_v29 = vpop.eup %3120  ;;  %2902 = vmatpush3.bf16.msra.mxu1 %v3580_v3  ;;  %3124 = vrcp.f32 %v1337_v10  ;;  %v1434_v39 = vmul.f32 %v3119_v37, %v3847_v14 }
 0x3ab   :  { %v3123_v42 = vpop.eup %3122  ;;  %2903 = vmatprep.subr.bf16.mxu1 %v3803_v33  ;;  %v1328_v11 = vpop.xlane.xlu1 %1327  ;;  %v1436_v25 = vmul.f32 %v3121_v29, %v3837_v53 }
 0x3ac   :  { %3126 = vrcp.f32 %v1328_v11  ;;  %v1435_v9 = vmul.f32 %v3123_v42, %v3852_v22 }
 0x3ad   :  { %3128 = vrcp.f32 %v1334_v15  ;;  %v1331_v43 = vpop.xlane.xlu0 %1330  ;;  %v1465_v61 = vpack.c.bf16 %v1437_v32, %v1436_v25 }
 0x3ae   :  { %2904 = vmatpush3.bf16.msra.mxu1 %v3803_v33  ;;  %3130 = vrcp.f32 %v1331_v43  ;;  %v1464_v3 = vpack.c.bf16 %v1435_v9, %v1434_v39 }
 0x3af   :  { %2909 = vmatprep.subr.bf16.mxu1 %v3583_v5 }
 0x3b0   :  { %2905 = vmatprep.mubr.msk.bf16.mxu1 %vm1109_vm3, %v1464_v3 }
 0x3b1   :  { %2906 = vmatmul.mubr.msk.bf16.vlgmr.msra.gmra.mrb[36].mxu1 %vm1109_vm3, %v1465_v61 }
 0x3b2   :  { %2910 = vmatpush3.bf16.msra.mxu1 %v3583_v5 }
 0x3b3   :  { %2911 = vmatprep.subr.bf16.mxu1 %v3805_v44 }
 0x3b4   :  { %v3125_v14 = vpop.eup %3124 }
 0x3b5   :  { %v1441_v52 = vmul.f32 %v3125_v14, %v3863_v20 }
 0x3b6   :  { %v3127_v22 = vpop.eup %3126  ;;  %2912 = vmatpush3.bf16.msra.mxu1 %v3805_v44 }
 0x3b7   :  { %v3129_v53 = vpop.eup %3128  ;;  %2917 = vmatprep.subr.bf16.mxu1 %v3585_v6  ;;  %v1346_v33 = vpop.xlane.xlu0 %1345  ;;  %v1438_v54 = vmul.f32 %v3127_v22, %v3868_v18 }
 0x3b8   :  { %v3131_v46 = vpop.eup %3130  ;;  %v1440_v57 = vmul.f32 %v3129_v53, %v3859_v34 }
 0x3b9   :  { %v1439_v41 = vmul.f32 %v3131_v46, %v3873_v8 }
 0x3ba   :  { %v1467_v21 = vpack.c.bf16 %v1441_v52, %v1440_v57 }
 0x3bb   :  { %v1340_v5 = vpop.xlane.xlu0 %1339  ;;  %v1466_v23 = vpack.c.bf16 %v1439_v41, %v1438_v54 }
 0x3bd   :  { %2913 = vmatprep.mubr.msk.bf16.mxu1 %vm1109_vm3, %v1466_v23 }
 0x3be   :  { %2914 = vmatmul.mubr.msk.bf16.vlgmr.msra.gmra.mrb[40].mxu1 %vm1109_vm3, %v1467_v21 }
 0x3bf   :  { %2918 = vmatpush3.bf16.msra.mxu1 %v3585_v6  ;;  %v1349_v44 = vpop.xlane.xlu0 %1348 }
 0x3c0   :  { %2919 = vmatprep.subr.bf16.mxu1 %v3587_v7  ;;  %3132 = vrcp.f32 %v1349_v44 }
 0x3c1   :  { %3134 = vrcp.f32 %v1340_v5 }
 0x3c2   :  { %3136 = vrcp.f32 %v1346_v33 }
 0x3c3   :  { %2920 = vmatpush3.bf16.msra.mxu1 %v3587_v7  ;;  %v1343_v20 = vpop.xlane.xlu0 %1342 }
 0x3c4   :  { %2925 = vmatprep.subr.bf16.mxu1 %v3807_v48  ;;  %3138 = vrcp.f32 %v1343_v20 }
 0x3c7   :  { %v1358_v34 = vpop.xlane.xlu1 %1357 }
 0x3ca   :  { %v3133_v18 = vpop.eup %3132 }
 0x3cb   :  { %v1352_v8 = vpop.xlane.xlu1 %1351  ;;  %v3135_v28 = vpop.eup %3134  ;;  %v1445_v13 = vmul.f32 %v3133_v18, %v3889_v17 }
 0x3cc   :  { %3140 = vrcp.f32 %v1352_v8  ;;  %v3137_v2 = vpop.eup %3136  ;;  %v1442_v15 = vmul.f32 %v3135_v28, %v3884_v35 }
 0x3cd   :  { %3142 = vrcp.f32 %v1358_v34  ;;  %v1355_v6 = vpop.xlane.xlu0 %1354  ;;  %v1444_v4 = vmul.f32 %v3137_v2, %v3879_v24 }
 0x3ce   :  { %v3139_v40 = vpop.eup %3138  ;;  %3144 = vrcp.f32 %v1355_v6 }
 0x3cf   :  { %v1361_v31 = vpop.xlane.xlu1 %1360  ;;  %v1443_v7 = vmul.f32 %v3139_v40, %v3895_v58  ;;  %v1469_v37 = vpack.c.bf16 %v1445_v13, %v1444_v4 }
 0x3d0   :  { %3146 = vrcp.f32 %v1361_v31 }
 0x3d1   :  { %v1468_v30 = vpack.c.bf16 %v1443_v7, %v1442_v15 }
 0x3d3   :  { %2921 = vmatprep.mubr.msk.bf16.mxu1 %vm1109_vm3, %v1468_v30 }
 0x3d4   :  { %2922 = vmatmul.mubr.msk.bf16.vlgmr.msra.gmra.mrb[44].mxu1 %vm1109_vm3, %v1469_v37 }
 0x3d5   :  { %2926 = vmatpush3.bf16.msra.mxu1 %v3807_v48 }
 0x3d6   :  { %v3141_v10 = vpop.eup %3140  ;;  %2927 = vmatprep.subr.bf16.mxu1 %v3811_v26 }
 0x3d7   :  { %v3143_v17 = vpop.eup %3142  ;;  %v1446_v35 = vmul.f32 %v3141_v10, %v3904_v19 }
 0x3d8   :  { %v3145_v29 = vpop.eup %3144  ;;  %v1448_v42 = vmul.f32 %v3143_v17, %v3899_v27 }
 0x3d9   :  { %2928 = vmatpush3.bf16.msra.mxu1 %v3811_v26  ;;  %v1447_v24 = vmul.f32 %v3145_v29, %v3911_v47  ;;  %v1370_v26 = vpop.xlane.xlu0 %1369 }
 0x3da   :  { %v3147_v58 = vpop.eup %3146  ;;  %2941 = vmatprep.subr.bf16.mxu1 %v3982_v45 }
 0x3db   :  { %v1449_v32 = vmul.f32 %v3147_v58, %v3907_v1  ;;  %v1364_v11 = vpop.xlane.xlu1 %1363  ;;  %v1470_v48 = vpack.c.bf16 %v1447_v24, %v1446_v35 }
 0x3dd   :  { %2929 = vmatprep.mubr.msk.bf16.mxu1 %vm1109_vm3, %v1470_v48  ;;  %v1471_v39 = vpack.c.bf16 %v1449_v32, %v1448_v42 }
 0x3df   :  { %v1373_v9 = vpop.xlane.xlu1 %1372  ;;  %2930 = vmatmul.mubr.msk.bf16.vlgmr.msra.gmra.mrb[48].mxu1 %vm1109_vm3, %v1471_v39 }
 0x3e0   :  { %2942 = vmatpush3.bf16.msra.mxu1 %v3982_v45  ;;  %3148 = vrcp.f32 %v1373_v9 }
 0x3e1   :  { %3150 = vrcp.f32 %v1364_v11 }
 0x3e2   :  { %3152 = vrcp.f32 %v1370_v26 }
 0x3e3   :  { %v1367_v19 = vpop.xlane.xlu1 %1366 }
 0x3e4   :  { %3154 = vrcp.f32 %v1367_v19 }
 0x3e7   :  { %v1382_v47 = vpop.xlane.xlu0 %1381 }
 0x3ea   :  { %v3149_v27 = vpop.eup %3148 }
 0x3eb   :  { %v1376_v25 = vpop.xlane.xlu1 %1375  ;;  %v3151_v1 = vpop.eup %3150  ;;  %v1453_v14 = vmul.f32 %v3149_v27, %v3929_v36 }
 0x3ec   :  { %3156 = vrcp.f32 %v1376_v25  ;;  %v3153_v43 = vpop.eup %3152  ;;  %v1450_v53 = vmul.f32 %v3151_v1, %v3924_v50 }
 0x3ed   :  { %v1379_v3 = vpop.xlane.xlu0 %1378  ;;  %v1452_v33 = vmul.f32 %v3153_v43, %v3919_v60 }
 0x3ee   :  { %v3155_v61 = vpop.eup %3154  ;;  %3158 = vrcp.f32 %v1379_v3 }
 0x3ef   :  { %v1385_v22 = vpop.xlane.xlu1 %1384  ;;  %v1451_v45 = vmul.f32 %v3155_v61, %v3935_v0  ;;  %v1473_v52 = vpack.c.bf16 %v1453_v14, %v1452_v33 }
 0x3f0   :  { %3160 = vrcp.f32 %v1385_v22 }
 0x3f1   :  { %v1472_v46 = vpack.c.bf16 %v1451_v45, %v1450_v53  ;;  %3162 = vrcp.f32 %v1382_v47  ;;  %v3200_v53 = vmov 1934713408  }
 0x3f2   :  { %v2033_v45 = vunpack.c.l.s4 %v3200_v53 }
 0x3f3   :  { %2937 = vmatprep.mubr.msk.bf16.mxu0 %vm1109_vm3, %v1472_v46 }
 0x3f4   :  { %2938 = vmatmul.mubr.msk.bf16.vlgmr.msra.gmra.mrb[64].mxu0 %vm1109_vm3, %v1473_v52  ;;  %v2034_v33 = vunpack.c.0.s8 %v2033_v45 }
 0x3f5   :  { %2950 = vmatpush3.bf16.msra.mxu0 %v3957_v59 }
 0x3f6   :  { %v3157_v54 = vpop.eup %3156 }
 0x3f7   :  { %v1394_v36 = vpop.xlane.xlu0 %1393  ;;  %v1454_v50 = vmul.f32 %v3157_v54, %v3944_v51 }
 0x3f8   :  { %v3159_v41 = vpop.eup %3158 }
 0x3f9   :  { %v1397_v57 = vpop.xlane.xlu1 %1396  ;;  %v1455_v0 = vmul.f32 %v3159_v41, %v3951_v16  ;;  %v4066_v41 = vsub.s32 %v2034_v33, %v3589_v12 }
 0x3fa   :  { %v3161_v5 = vpop.eup %3160  ;;  %3164 = vrcp.f32 %v1397_v57 }
 0x3fb   :  { %v1388_v60 = vpop.xlane.xlu0 %1387  ;;  %v1474_v23 = vpack.c.bf16 %v1455_v0, %v1454_v50  ;;  %v3163_v21 = vpop.eup %3162  ;;  %v1457_v59 = vmul.f32 %v3161_v5, %v3947_v55 }
 0x3fc   :  { %3166 = vrcp.f32 %v1388_v60  ;;  %v1456_v34 = vmul.f32 %v3163_v21, %v3939_v62 }
 0x3fd   :  { %3168 = vrcp.f32 %v1394_v36  ;;  %v1391_v44 = vpop.xlane.xlu1 %1390  ;;  %2945 = vmatprep.mubr.msk.bf16.mxu1 %vm1109_vm3, %v1474_v23 }
 0x3fe   :  { %3170 = vrcp.f32 %v1391_v44  ;;  %v1475_v16 = vpack.c.bf16 %v1457_v59, %v1456_v34 }
 0x3ff   :  { %v1847_v20 = vpop.permute.xlu0 %1846 }
 0x400   :  { %2943 = vmatprep.subr.bf16.mxu1 %v1847_v20 }
 0x401   :  { %v1908_v51 = vpop.permute.xlu1 %1907  ;;  %2944 = vmatpush3.bf16.msra.mxu1 %v1847_v20 }
 0x402   :  { %2951 = vmatprep.subr.bf16.mxu0 %v1908_v51 }
 0x403   :  { %2952 = vmatpush3.bf16.msra.mxu0 %v1908_v51 }
 0x404   :  { %2946 = vmatmul.mubr.msk.bf16.vlgmr.msra.gmra.mrb[52].mxu1 %vm1109_vm3, %v1475_v16  ;;  %v3165_v18 = vpop.eup %3164 }
 0x405   :  { %v1461_v6 = vmul.f32 %v3165_v18, %v3966_v56 }
 0x406   :  { %v3167_v8 = vpop.eup %3166 }
 0x407   :  { %v3169_v28 = vpop.eup %3168  ;;  %v1458_v55 = vmul.f32 %v3167_v8, %v3970_v49  ;;  %v3199_v49 = vmov 1983009808  }
 0x408   :  { %v3171_v2 = vpop.eup %3170  ;;  %v1460_v62 = vmul.f32 %v3169_v28, %v3962_v38 }
 0x409   :  { %v1459_v40 = vmul.f32 %v3171_v2, %v3974_v63  ;;  %v1969_v63 = vunpack.c.l.s4 %v3199_v49 }
 0x40a   :  { %v1477_v31 = vpack.c.bf16 %v1461_v6, %v1460_v62 }
 0x40b   :  { %v1476_v13 = vpack.c.bf16 %v1459_v40, %v1458_v55  ;;  %v1970_v29 = vunpack.c.0.s8 %v1969_v63 }
 0x40d   :  { %2953 = vmatprep.mubr.msk.bf16.mxu0 %vm1109_vm3, %v1476_v13  ;;  %v4055_v38 = vsub.s32 %v1970_v29, %v3589_v12 }
 0x40e   :  { %2954 = vmatmul.mubr.msk.bf16.vlgmr.msra.gmra.mrb[68].mxu0 %vm1109_vm3, %v1477_v31 }
 0x47c   :  { %v2899_v15 = vpop.f32.mrb[32].mxu1 }
 0x47d   :  { %v1524_v7 = vpop.f32.mrb[33].mxu1 }
 0x47e   :  { %v2900_v4 = vpop.f32.mrb[34].mxu1 }
 0x47f   :  { %v1527_v30 = vpop.f32.mrb[35].mxu1 }
 0x484   :  { %v2907_v37 = vpop.f32.mrb[36].mxu1 }
 0x485   :  { %v1585_v10 = vpop.f32.mrb[37].mxu1 }
 0x486   :  { %v4050_v17 = vpop.f32.mrb[38].mxu1 }
 0x487   :  { %v4052_v56 = vpop.f32.mrb[39].mxu1 }
 0x491   :  { %v2915_v35 = vpop.f32.mrb[40].mxu1 }
 0x492   :  { %v2238_v24 = vcombine.low %v2899_v15, %v2915_v35  ;;  %v2239_v58 = vcombine.high %v2899_v15, %v2915_v35  ;;  %v1646_v42 = vpop.f32.mrb[41].mxu1 }
 0x493   :  { %v1966_v32 = vcombine.low %v1524_v7, %v1646_v42  ;;  %v1967_v11 = vcombine.high %v1524_v7, %v1646_v42  ;;  %v2916_v48 = vpop.f32.mrb[42].mxu1 }
 0x494   :  { %v2246_v39 = vrot.slane %v2238_v24, %v4055_v38  ;;  %v2253_v9 = vrot.slane %v2239_v58, %v4055_v38  ;;  %v2374_v26 = vcombine.low %v2900_v4, %v2916_v48  ;;  %v2375_v19 = vcombine.high %v2900_v4, %v2916_v48  ;;  %v1649_v47 = vpop.f32.mrb[43].mxu1 }
 0x495   :  { %v1974_v27 = vrot.slane %v1966_v32, %v4055_v38  ;;  %v1981_v25 = vrot.slane %v1967_v11, %v4055_v38  ;;  %v2102_v1 = vcombine.low %v1527_v30, %v1649_v47  ;;  %v2103_v43 = vcombine.high %v1527_v30, %v1649_v47 }
 0x496   :  { %v2382_v3 = vrot.slane %v2374_v26, %v4055_v38  ;;  %v2389_v61 = vrot.slane %v2375_v19, %v4055_v38 }
 0x497   :  { %v2110_v14 = vrot.slane %v2102_v1, %v4055_v38  ;;  %v2117_v22 = vrot.slane %v2103_v43, %v4055_v38 }
 0x4a7   :  { %v2923_v46 = vpop.f32.mrb[44].mxu1 }
 0x4a8   :  { %v2254_v52 = vcombine.low %v2907_v37, %v2923_v46  ;;  %v2255_v54 = vcombine.high %v2907_v37, %v2923_v46  ;;  %v1707_v36 = vpop.f32.mrb[45].mxu1 }
 0x4a9   :  { %v1982_v57 = vcombine.low %v1585_v10, %v1707_v36  ;;  %v1983_v50 = vcombine.high %v1585_v10, %v1707_v36  ;;  %v2924_v0 = vpop.f32.mrb[46].mxu1 }
 0x4aa   :  { %v2262_v5 = vrot.slane %v2254_v52, %v4055_v38  ;;  %v2269_v60 = vrot.slane %v2255_v54, %v4055_v38  ;;  %v2390_v23 = vcombine.low %v4050_v17, %v2924_v0  ;;  %v2391_v21 = vcombine.high %v4050_v17, %v2924_v0  ;;  %v1710_v44 = vpop.f32.mrb[47].mxu1 }
 0x4ab   :  { %v1990_v59 = vrot.slane %v1982_v57, %v4055_v38  ;;  %v1997_v20 = vrot.slane %v1983_v50, %v4055_v38  ;;  %v2118_v34 = vcombine.low %v4052_v56, %v1710_v44  ;;  %v2119_v12 = vcombine.high %v4052_v56, %v1710_v44 }
 0x4ac   :  { %v2302_v51 = vcombine.low %v2246_v39, %v2262_v5  ;;  %v2303_v16 = vcombine.high %v2246_v39, %v2262_v5  ;;  %v2318_v18 = vcombine.low %v2253_v9, %v2269_v60  ;;  %v2319_v8 = vcombine.high %v2253_v9, %v2269_v60 }
 0x4ad   :  { %v2030_v28 = vcombine.low %v1974_v27, %v1990_v59  ;;  %v2031_v2 = vcombine.high %v1974_v27, %v1990_v59  ;;  %v2046_v6 = vcombine.low %v1981_v25, %v1997_v20  ;;  %v2047_v55 = vcombine.high %v1981_v25, %v1997_v20 }
 0x4ae   :  { %v4077_v40 = vrot.slane %v2303_v16, %v4066_v41  ;;  %v4080_v62 = vrot.slane %v2318_v18, %v4066_v41  ;;  %v4083_v13 = vrot.slane %v2319_v8, %v4066_v41  ;;  %v2398_v31 = vrot.slane %v2390_v23, %v4055_v38 }
 0x4af   :  { %v4087_v15 = vrot.slane %v2030_v28, %v4066_v41  ;;  %v4090_v7 = vrot.slane %v2031_v2, %v4066_v41  ;;  %v4093_v4 = vrot.slane %v2046_v6, %v4066_v41  ;;  %v4096_v30 = vrot.slane %v2047_v55, %v4066_v41 }
 0x4b0   :  { %v2405_v37 = vrot.slane %v2391_v21, %v4055_v38  ;;  %v2438_v10 = vcombine.low %v2382_v3, %v2398_v31  ;;  %v2439_v17 = vcombine.high %v2382_v3, %v2398_v31  ;;  %v2126_v56 = vrot.slane %v2118_v34, %v4055_v38 }
 0x4b1   :  { %v2133_v49 = vrot.slane %v2119_v12, %v4055_v38  ;;  %v4102_v63 = vrot.slane %v2302_v51, %v4066_v41 }
 0x4b2   :  { %v4105_v29 = vrot.slane %v2439_v17, %v4066_v41  ;;  %v2454_v35 = vcombine.low %v2389_v61, %v2405_v37  ;;  %v2455_v24 = vcombine.high %v2389_v61, %v2405_v37  ;;  %v2166_v58 = vcombine.low %v2110_v14, %v2126_v56  ;;  %v2931_v42 = vpop.f32.mrb[48].mxu1 }
 0x4b3   :  { %v2167_v32 = vcombine.high %v2110_v14, %v2126_v56  ;;  %v2182_v11 = vcombine.low %v2117_v22, %v2133_v49  ;;  %v2183_v48 = vcombine.high %v2117_v22, %v2133_v49  ;;  %v1768_v39 = vpop.f32.mrb[49].mxu1  ;;  %v4108_v9 = vrot.slane %v2438_v10, %v4066_v41 }
 0x4b4   :  { %v4111_v26 = vrot.slane %v2454_v35, %v4066_v41  ;;  %v4114_v19 = vrot.slane %v2455_v24, %v4066_v41  ;;  %v4117_v47 = vrot.slane %v2166_v58, %v4066_v41  ;;  %v2932_v27 = vpop.f32.mrb[50].mxu1 }
 0x4b5   :  { %v4120_v25 = vrot.slane %v2167_v32, %v4066_v41  ;;  %v4123_v1 = vrot.slane %v2182_v11, %v4066_v41  ;;  %v4126_v43 = vrot.slane %v2183_v48, %v4066_v41  ;;  %v1771_v3 = vpop.f32.mrb[51].mxu1 }
 0x4c7   :  { %v2939_v61 = vpop.f32.mrb[64].mxu0 }
 0x4c8   :  { %v1829_v14 = vpop.f32.mrb[65].mxu0 }
 0x4c9   :  { %v2940_v22 = vpop.f32.mrb[66].mxu0 }
 0x4ca   :  { %v1832_v53 = vpop.f32.mrb[67].mxu0 }
 0x4d7   :  { %v2947_v45 = vpop.f32.mrb[52].mxu1 }
 0x4d8   :  { %v2270_v33 = vcombine.low %v2931_v42, %v2947_v45  ;;  %v2271_v46 = vcombine.high %v2931_v42, %v2947_v45  ;;  %v1890_v52 = vpop.f32.mrb[53].mxu1 }
 0x4d9   :  { %v1998_v54 = vcombine.low %v1768_v39, %v1890_v52  ;;  %v1999_v36 = vcombine.high %v1768_v39, %v1890_v52  ;;  %v2948_v57 = vpop.f32.mrb[54].mxu1 }
 0x4da   :  { %v2278_v50 = vrot.slane %v2270_v33, %v4055_v38  ;;  %v2285_v0 = vrot.slane %v2271_v46, %v4055_v38  ;;  %v2406_v5 = vcombine.low %v2932_v27, %v2948_v57  ;;  %v2407_v60 = vcombine.high %v2932_v27, %v2948_v57  ;;  %v1893_v23 = vpop.f32.mrb[55].mxu1 }
 0x4db   :  { %v2006_v21 = vrot.slane %v1998_v54, %v4055_v38  ;;  %v2013_v44 = vrot.slane %v1999_v36, %v4055_v38  ;;  %v2134_v59 = vcombine.low %v1771_v3, %v1893_v23  ;;  %v2135_v20 = vcombine.high %v1771_v3, %v1893_v23 }
 0x4dc   :  { %v2414_v34 = vrot.slane %v2406_v5, %v4055_v38  ;;  %v2421_v12 = vrot.slane %v2407_v60, %v4055_v38 }
 0x4dd   :  { %v2142_v51 = vrot.slane %v2134_v59, %v4055_v38  ;;  %v2149_v16 = vrot.slane %v2135_v20, %v4055_v38 }
 0x4e1   :  { %v2955_v18 = vpop.f32.mrb[68].mxu0 }
 0x4e2   :  { %v2286_v8 = vcombine.low %v2939_v61, %v2955_v18  ;;  %v2287_v28 = vcombine.high %v2939_v61, %v2955_v18  ;;  %v1951_v2 = vpop.f32.mrb[69].mxu0 }
 0x4e3   :  { %v2014_v6 = vcombine.low %v1829_v14, %v1951_v2  ;;  %v2015_v55 = vcombine.high %v1829_v14, %v1951_v2  ;;  %v2956_v31 = vpop.f32.mrb[70].mxu0 }
 0x4e4   :  { %v2294_v37 = vrot.slane %v2286_v8, %v4055_v38  ;;  %v2301_v10 = vrot.slane %v2287_v28, %v4055_v38  ;;  %v2422_v17 = vcombine.low %v2940_v22, %v2956_v31  ;;  %v2423_v56 = vcombine.high %v2940_v22, %v2956_v31  ;;  %v1954_v49 = vpop.f32.mrb[71].mxu0 }
 0x4e5   :  { %v2022_v35 = vrot.slane %v2014_v6, %v4055_v38  ;;  %v2029_v24 = vrot.slane %v2015_v55, %v4055_v38  ;;  %v2150_v58 = vcombine.low %v1832_v53, %v1954_v49  ;;  %v2151_v42 = vcombine.high %v1832_v53, %v1954_v49 }
 0x4e6   :  { %v2334_v32 = vcombine.low %v2278_v50, %v2294_v37  ;;  %v2335_v11 = vcombine.high %v2278_v50, %v2294_v37  ;;  %v2350_v48 = vcombine.low %v2285_v0, %v2301_v10  ;;  %v2351_v39 = vcombine.high %v2285_v0, %v2301_v10 }
 0x4e7   :  { %v2062_v27 = vcombine.low %v2006_v21, %v2022_v35  ;;  %v2063_v3 = vcombine.high %v2006_v21, %v2022_v35  ;;  %v2078_v61 = vcombine.low %v2013_v44, %v2029_v24  ;;  %v2079_v14 = vcombine.high %v2013_v44, %v2029_v24 }
 0x4e8   :  { %v4141_v45 = vrot.slane %v2335_v11, %v4066_v41  ;;  %v4144_v22 = vrot.slane %v2350_v48, %v4066_v41  ;;  %v4147_v33 = vrot.slane %v2351_v39, %v4066_v41  ;;  %v2430_v46 = vrot.slane %v2422_v17, %v4055_v38 }
 0x4e9   :  { %v4151_v53 = vrot.slane %v2062_v27, %v4066_v41  ;;  %v4154_v52 = vrot.slane %v2063_v3, %v4066_v41  ;;  %v4157_v54 = vrot.slane %v2078_v61, %v4066_v41  ;;  %v4160_v36 = vrot.slane %v2079_v14, %v4066_v41 }
 0x4ea   :  { %v2437_v57 = vrot.slane %v2423_v56, %v4055_v38  ;;  %v2470_v50 = vcombine.low %v2414_v34, %v2430_v46  ;;  %v2471_v0 = vcombine.high %v2414_v34, %v2430_v46  ;;  %v2158_v5 = vrot.slane %v2150_v58, %v4055_v38 }
 0x4eb   :  { %v2165_v60 = vrot.slane %v2151_v42, %v4055_v38  ;;  %v4166_v23 = vrot.slane %v2334_v32, %v4066_v41  ;;  %v2368_v21 = vcombine.low %v4077_v40, %v4141_v45  ;;  %v2369_v44 = vcombine.high %v4077_v40, %v4141_v45 }
 0x4ec   :  { %v2485_v59 = vrot.slane %v2471_v0, %v4066_v41  ;;  %v2486_v20 = vcombine.low %v2421_v12, %v2437_v57  ;;  %v2487_v18 = vcombine.high %v2421_v12, %v2437_v57  ;;  %v2198_v8 = vcombine.low %v2142_v51, %v2158_v5 }
 0x4ed   :  { %v2199_v28 = vcombine.high %v2142_v51, %v2158_v5  ;;  %v2214_v34 = vcombine.low %v2149_v16, %v2165_v60  ;;  %v2215_v2 = vcombine.high %v2149_v16, %v2165_v60  ;;  %v2367_v38 = vcombine.high %v4102_v63, %v4166_v23 }
 0x4ee   :  { %v2494_v6 = vrot.slane %v2486_v20, %v4066_v41  ;;  %v4177_v55 = vrot.slane %v2487_v18, %v4066_v41  ;;  %v4180_v31 = vrot.slane %v2198_v8, %v4066_v41  ;;  %v4183_v40 = vrot.slane %v2470_v50, %v4066_v41 }
 0x4ef   :  { %v2213_v12 = vrot.slane %v2199_v28, %v4066_v41  ;;  %v2222_v51 = vrot.slane %v2214_v34, %v4066_v41  ;;  %v2229_v16 = vrot.slane %v2215_v2, %v4066_v41  ;;  %2567 = vrot.lane.b32.xlu0 %v2367_v38, %s3201_s2  ;;  %v2504_v37 = vcombine.low %v4105_v29, %v2485_v59 }
 0x4f0   :  { %v2503_v10 = vcombine.high %v4108_v9, %v4183_v40  ;;  %v2505_v17 = vcombine.high %v4105_v29, %v2485_v59  ;;  %v2370_v56 = vcombine.low %v4080_v62, %v4144_v22  ;;  %v2506_v49 = vcombine.low %v4111_v26, %v2494_v6 }
 0x4f1   :  { %v2371_v35 = vcombine.high %v4080_v62, %v4144_v22  ;;  %v2507_v41 = vcombine.high %v4111_v26, %v2494_v6  ;;  %v2372_v24 = vcombine.low %v4083_v13, %v4147_v33  ;;  %v2508_v58 = vcombine.low %v4114_v19, %v4177_v55 }
 0x4f2   :  { %2595 = vrot.lane.b32.xlu1 %v2503_v10, %s3201_s2  ;;  %v2095_v29 = vcombine.high %v4087_v15, %v4151_v53  ;;  %v2231_v42 = vcombine.high %v4117_v47, %v4180_v31  ;;  %v2096_v32 = vcombine.low %v4090_v7, %v4154_v52  ;;  %v2232_v62 = vcombine.low %v4120_v25, %v2213_v12 }
 0x4f3   :  { %2571 = vrot.lane.b32.xlu0 %v2368_v21, %s3202_s19  ;;  %v2097_v26 = vcombine.high %v4090_v7, %v4154_v52  ;;  %v2233_v11 = vcombine.high %v4120_v25, %v2213_v12  ;;  %v2098_v48 = vcombine.low %v4093_v4, %v4157_v54  ;;  %v2234_v39 = vcombine.low %v4123_v1, %v2222_v51 }
 0x4f4   :  { %v2099_v27 = vcombine.high %v4093_v4, %v4157_v54  ;;  %v2235_v3 = vcombine.high %v4123_v1, %v2222_v51  ;;  %v2100_v61 = vcombine.low %v4096_v30, %v4160_v36  ;;  %v2236_v14 = vcombine.low %v4126_v43, %v2229_v16 }
 0x4f5   :  { %v2101_v7 = vcombine.high %v4096_v30, %v4160_v36  ;;  %v2237_v25 = vcombine.high %v4126_v43, %v2229_v16  ;;  %v2373_v45 = vcombine.high %v4083_v13, %v4147_v33  ;;  %v2509_v22 = vcombine.high %v4114_v19, %v4177_v55 }
 0x4f6   :  { %2599 = vrot.lane.b32.xlu1 %v2504_v37, %s3202_s19  ;;  %v2366_v4 = vcombine.low %v4102_v63, %v4166_v23  ;;  %v2502_v1 = vcombine.low %v4108_v9, %v4183_v40  ;;  %v2094_v30 = vcombine.low %v4087_v15, %v4151_v53  ;;  %v2230_v43 = vcombine.low %v4117_v47, %v4180_v31 }
 0x4f7   :  { %2575 = vrot.lane.b32.xlu0 %v2369_v44, %s3203_s20 }
 0x4fa   :  { %2603 = vrot.lane.b32.xlu1 %v2505_v17, %s3203_s20 }
 0x4fb   :  { %2579 = vrot.lane.b32.xlu0 %v2370_v56, %s3204_s21 }
 0x4fe   :  { %2607 = vrot.lane.b32.xlu1 %v2506_v49, %s3204_s21 }
 0x4ff   :  { %2583 = vrot.lane.b32.xlu0 %v2371_v35, %s3205_s22 }
 0x502   :  { %2611 = vrot.lane.b32.xlu1 %v2507_v41, %s3205_s22 }
 0x503   :  { %2587 = vrot.lane.b32.xlu0 %v2372_v24, %s3198_s0 }
 0x506   :  { %2615 = vrot.lane.b32.xlu1 %v2508_v58, %s3198_s0 }
 0x507   :  { %2511 = vrot.lane.b32.xlu0 %v2095_v29, %s3201_s2 }
 0x50a   :  { %2539 = vrot.lane.b32.xlu1 %v2231_v42, %s3201_s2 }
 0x50b   :  { %2515 = vrot.lane.b32.xlu0 %v2096_v32, %s3202_s19 }
 0x50e   :  { %2543 = vrot.lane.b32.xlu1 %v2232_v62, %s3202_s19 }
 0x50f   :  { %2519 = vrot.lane.b32.xlu0 %v2097_v26, %s3203_s20 }
 0x512   :  { %2547 = vrot.lane.b32.xlu1 %v2233_v11, %s3203_s20 }
 0x513   :  { %2523 = vrot.lane.b32.xlu0 %v2098_v48, %s3204_s21 }
 0x516   :  { %2551 = vrot.lane.b32.xlu1 %v2234_v39, %s3204_s21 }
 0x517   :  { %2527 = vrot.lane.b32.xlu0 %v2099_v27, %s3205_s22 }
 0x51a   :  { %2555 = vrot.lane.b32.xlu1 %v2235_v3, %s3205_s22 }
 0x51b   :  { %2531 = vrot.lane.b32.xlu0 %v2100_v61, %s3198_s0 }
 0x51e   :  { %2559 = vrot.lane.b32.xlu1 %v2236_v14, %s3198_s0 }
 0x51f   :  { %2535 = vrot.lane.b32.xlu0 %v2101_v7, %s3197_s1 }
 0x522   :  { %2563 = vrot.lane.b32.xlu1 %v2237_v25, %s3197_s1 }
 0x523   :  { %2591 = vrot.lane.b32.xlu0 %v2373_v45, %s3197_s1 }
 0x526   :  { %2619 = vrot.lane.b32.xlu1 %v2509_v22, %s3197_s1 }
 0x561   :  { %v2568_v13 = vpop.permute.xlu0 %2567 }
 0x562   :  { %v2640_v12 = vsel %vm527_vm1, %v2366_v4, %v2568_v13 }
 0x564   :  { %v2596_v15 = vpop.permute.xlu1 %2595 }
 0x565   :  { %v2572_v19 = vpop.permute.xlu0 %2571  ;;  %v2647_v23 = vsel %vm527_vm1, %v2502_v1, %v2596_v15 }
 0x566   :  { %v2641_v10 = vsel %vm1109_vm3, %v2640_v12, %v2572_v19 }
 0x568   :  { %v2600_v47 = vpop.permute.xlu1 %2599 }
 0x569   :  { %v2576_v33 = vpop.permute.xlu0 %2575  ;;  %v2648_v29 = vsel %vm1109_vm3, %v2647_v23, %v2600_v47 }
 0x56a   :  { %v2642_v35 = vsel %vm2624_vm7, %v2641_v10, %v2576_v33 }
 0x56c   :  { %v2604_v46 = vpop.permute.xlu1 %2603 }
 0x56d   :  { %v2580_v53 = vpop.permute.xlu0 %2579  ;;  %v2649_v26 = vsel %vm2624_vm7, %v2648_v29, %v2604_v46 }
 0x56e   :  { %v2643_v24 = vsel %vm295_vm0, %v2642_v35, %v2580_v53 }
 0x570   :  { %v2608_v52 = vpop.permute.xlu1 %2607 }
 0x571   :  { %v2584_v54 = vpop.permute.xlu0 %2583  ;;  %v2650_v48 = vsel %vm295_vm0, %v2649_v26, %v2608_v52 }
 0x572   :  { %v2644_v42 = vsel %vm2627_vm8, %v2643_v24, %v2584_v54 }
 0x574   :  { %v2612_v36 = vpop.permute.xlu1 %2611 }
 0x575   :  { %v2588_v57 = vpop.permute.xlu0 %2587  ;;  %v2651_v27 = vsel %vm2627_vm8, %v2650_v48, %v2612_v36 }
 0x576   :  { %v2645_v11 = vsel %vm2629_vm10, %v2644_v42, %v2588_v57 }
 0x578   :  { %v2616_v50 = vpop.permute.xlu1 %2615 }
 0x579   :  { %v2512_v0 = vpop.permute.xlu0 %2511  ;;  %v2652_v3 = vsel %vm2629_vm10, %v2651_v27, %v2616_v50 }
 0x57a   :  { %v2622_v28 = vsel %vm527_vm1, %v2094_v30, %v2512_v0 }
 0x57c   :  { %v2540_v5 = vpop.permute.xlu1 %2539 }
 0x57d   :  { %v2516_v60 = vpop.permute.xlu0 %2515  ;;  %v2633_v55 = vsel %vm527_vm1, %v2230_v43, %v2540_v5 }
 0x57e   :  { %v2623_v2 = vsel %vm1109_vm3, %v2622_v28, %v2516_v60 }
 0x580   :  { %v2544_v21 = vpop.permute.xlu1 %2543 }
 0x581   :  { %v2520_v44 = vpop.permute.xlu0 %2519  ;;  %v2634_v51 = vsel %vm1109_vm3, %v2633_v55, %v2544_v21 }
 0x582   :  { %v2625_v6 = vsel %vm2624_vm7, %v2623_v2, %v2520_v44 }
 0x584   :  { %v2548_v59 = vpop.permute.xlu1 %2547 }
 0x585   :  { %v2524_v20 = vpop.permute.xlu0 %2523  ;;  %v2635_v17 = vsel %vm2624_vm7, %v2634_v51, %v2548_v59 }
 0x586   :  { %v2626_v31 = vsel %vm295_vm0, %v2625_v6, %v2524_v20 }
 0x588   :  { %v2552_v18 = vpop.permute.xlu1 %2551 }
 0x589   :  { %v2528_v8 = vpop.permute.xlu0 %2527  ;;  %v2636_v41 = vsel %vm295_vm0, %v2635_v17, %v2552_v18 }
 0x58a   :  { %v2628_v16 = vsel %vm2627_vm8, %v2626_v31, %v2528_v8 }
 0x58c   :  { %v2556_v34 = vpop.permute.xlu1 %2555 }
 0x58d   :  { %v2532_v38 = vpop.permute.xlu0 %2531  ;;  %v2637_v58 = vsel %vm2627_vm8, %v2636_v41, %v2556_v34 }
 0x58e   :  { %v2630_v56 = vsel %vm2629_vm10, %v2628_v16, %v2532_v38 }
 0x590   :  { %v2560_v37 = vpop.permute.xlu1 %2559 }
 0x591   :  { %v2536_v49 = vpop.permute.xlu0 %2535  ;;  %v2638_v32 = vsel %vm2629_vm10, %v2637_v58, %v2560_v37 }
 0x592   :  { %v2632_v63 = vsel %vm2631_vm9, %v2630_v56, %v2536_v49 }
 0x593   :  { %2654 = vst [vmem:[#allocation2] sm:$0xff] %v2632_v63 }
 0x594   :  { %v2564_v62 = vpop.permute.xlu1 %2563 }
 0x595   :  { %v2639_v9 = vsel %vm2631_vm9, %v2638_v32, %v2564_v62  ;;  %v2592_v40 = vpop.permute.xlu0 %2591 }
 0x596   :  { %2655 = vst [vmem:[#allocation2 + $0x8] sm:$0xff] %v2639_v9  ;;  %v2646_v39 = vsel %vm2631_vm9, %v2645_v11, %v2592_v40 }
 0x597   :  { %2656 = vst [vmem:[#allocation2 + $0x10] sm:$0xff] %v2646_v39 }
 0x598   :  { %v2620_v61 = vpop.permute.xlu1 %2619 }
 0x599   :  { %v2653_v14 = vsel %vm2631_vm9, %v2652_v3, %v2620_v61 }
 0x59a   :  { %2657 = vst [vmem:[#allocation2 + $0x18] sm:$0xff] %v2653_v14 }
 0x59b   :  { %3183 = shalt.err (!%p3180_p4)
}
 0x59c   :  { %s3184_s28 = scalar_lea.hbm %s4301_s3, 512 }
 0x59d   :  { %p3185_p5 = scmp.ne.s32.totalorder %s4301_s3, %s3184_s28  ;;  %p3188_p6 = scmp.lt.u32.totalorder %s3184_s28, %s4301_s3 }
 0x59f   :  { %p3190_p7 = pnand %p3188_p6, %p3185_p5 }
 0x5a1   :  { %3193 = shalt.err (!%p3190_p7)
}
 0x5a2   :  { %2667 = dma.vmem_to_hbm [thread:$0]  %s2665_s24, 512, %s4301_s3, [#allocation3]  }
 0x5a3   :  { %3194 = dma.done.wait [#allocation3], 512  }
 0x5a4   :  { %3195 = vsyncadd [#allocation3], 4294966784 }
 0x5a5   :  { %2671 = vsyncpa [#allocation3], 1 }

</bundles_post_ra>
